<compile_context>
chip_gen: v7x
topology: tpu7x:2x2x1
jax: 0.10.0
libtpu: 0.0.40
codegen_flags: <defaults>
</compile_context>

<pallas_src>
import jax
import jax.numpy as jnp
from jax.experimental import pallas as pl
from jax.experimental.pallas import tpu as pltpu  # noqa: F401  (TPU backend)

IMG_SIZE = 256

# ------------- small config, self-consistent with decoder.__init__ ----------
BS = 2
GF_DIM = 256                   # global_feature_dim (2048 in real model)
GCN_IN = [64, 32, 32]          # gcn_in_dim
GCN_OUT = [32, 32, 32]         # gcn_out_dim (gcn_out_dim[i] == gcn_in_dim[i+1])
C_OUT = GCN_OUT[-1]            # 32
V_IN = 64                      # vNum_in
V_OUT = 32                     # vNum_out
V_MANO = 80                    # vNum_mano (778 in real model)
D_GF = GCN_IN[0] - 3           # per-hand gf_layer width (61)
DPAD = 64                      # D_GF padded for sublane-tile-aligned slices
C_IN = GCN_IN[0]               # 64
N_HANDS = 2
HB = N_HANDS * BS              # 4 (hand, batch) samples fused per call
V_MANO_PAD = 96                # per-sample lane stride of the MANO output slab
assert (HB * V_OUT) % 128 == 0 and (HB * V_MANO_PAD) % 128 == 0
LN_EPS = 1e-6                  # decoder uses nn.LayerNorm(..., eps=1e-06)


# =============================== Pallas kernel ===============================
def _decoder_fused_kernel(x_ref, wgf_ref, pcol_ref, wdg2_ref, sel_ref,
                          pebias_ref, wh6_ref, wavg_ref, wup_ref,
                          outa_ref, mano_ref):
    pcol = pcol_ref[...]                                    # (2*DPAD, 8) packed columns

    # --- gf_layer, both hands stacked on rows; x stays (B, GF_DIM): A @ B^T --
    hT = jax.lax.dot_general(
        wgf_ref[...], x_ref[...],
        dimension_numbers=(((1,), (1,)), ((), ())),
        preferred_element_type=jnp.float32) + pcol[:, 0:1]  # (2*DPAD, B)

    mask = pcol[:, 1:2]                                     # 1.0 on the 61 real rows
    inv_d = 1.0 / float(D_GF)

    def ln_scaled(block, m):
        # LayerNorm (eps=1e-6) WITHOUT the affine part: gamma is folded into
        # the W_dg projection weights and beta into the pe/bias slab (exact).
        mu = jnp.sum(block, axis=0, keepdims=True) * inv_d  # pad rows are exactly 0
        c = (block - mu) * m                                # mask pad rows for var
        var = jnp.sum(c * c, axis=0, keepdims=True) * inv_d
        return c * jax.lax.rsqrt(var + LN_EPS)

    gl = ln_scaled(hT[:DPAD, :], mask[:DPAD, :])            # (DPAD, B)
    gr = ln_scaled(hT[DPAD:, :], mask[DPAD:, :])            # (DPAD, B)

    wdg2 = wdg2_ref[...]                                    # (2*C_OUT, DPAD)
    projT_l = jnp.dot(wdg2[:C_OUT, :], gl, preferred_element_type=jnp.float32)
    projT_r = jnp.dot(wdg2[C_OUT:, :], gr, preferred_element_type=jnp.float32)
    projT = jnp.concatenate([projT_l, projT_r], axis=1)     # (C_OUT, HB)

    # DualGraph stand-in, lane-batched over all samples (lane = hb*V_OUT + v):
    # rank-1 trick -> broadcast(gf)-then-pool == proj * colsum(pool); pe branch,
    # b_dg and the LayerNorm beta fold live in the precomputed pe/bias slab.
    f1 = (jnp.dot(projT, sel_ref[...], preferred_element_type=jnp.float32)
          + pebias_ref[...])                                # (C_OUT, HB*V_OUT)

    # merged coord + params heads (N = 128 lanes)
    h6 = jnp.dot(wh6_ref[...], f1, preferred_element_type=jnp.float32)   # (6, 128)
    v3dT = h6[0:3, :] + pcol[0:3, 2:3]                      # + b_coord
    # avg_head over vertices (block-diag weights) + folded b_avg/b_params bias
    t_slab = (jnp.dot(h6[3:6, :], wavg_ref[...],
                      preferred_element_type=jnp.float32)
              + pcol[0:3, 3:4])                             # (3, 128); lanes 0:HB valid

    outa_ref[...] = jnp.concatenate([v3dT, t_slab], axis=0)              # (6, 128)
    # block-diagonal MANO upsample: one matmul for all samples
    mano_ref[...] = jnp.dot(v3dT, wup_ref[...],
                            preferred_element_type=jnp.float32)          # (3, 384)


def _full_spec(shape):
    zeros = (0,) * len(shape)
    return pl.BlockSpec(shape, lambda i, zeros=zeros: zeros)


def decoder_fused(x, kp):
    assert x.shape == (BS, GF_DIM)
    ins = (x, kp["W_gfT"], kp["P_cols"], kp["W_dg2T"], kp["Sel"], kp["pe_bias"],
           kp["W_h6T"], kp["Wavg_blk"], kp["Wup_blk"])
    out_shape = (jax.ShapeDtypeStruct((6, HB * V_OUT), jnp.float32),
                 jax.ShapeDtypeStruct((3, HB * V_MANO_PAD), jnp.float32))
    return pl.pallas_call(
        _decoder_fused_kernel,
        out_shape=out_shape,
        grid=(1,),
        in_specs=[_full_spec(a.shape) for a in ins],
        out_specs=tuple(_full_spec(s.shape) for s in out_shape),
    )(*ins)


# ================================ glue (JAX) =================================
def projection_batch(scale, trans2d, label3d, img_size=IMG_SIZE):
    # TODO(synk): projection_batch source not provided; standard IntagHand
    # weak-perspective projection (elementwise, fused by XLA under jit).
    s = (scale * img_size)[:, None, None]
    t = (trans2d * img_size / 2 + img_size / 2)[:, None, :]
    return s * label3d[..., :2] + t


def decoder_forward(packed, x, fmaps):
    assert x.shape[1] == GF_DIM
    fmaps = fmaps[:-1]   # parity with reference; unused by the DualGraph stand-in
    bs = x.shape[0]
    hb = N_HANDS * bs

    # get_hand_pe / DualGraph: TODO(synk): dense_coor / GCN_vert_convert /
    # graph_avg_pool / DualGraph sources not provided; the stand-in (graph
    # avg-pool + shared channel projection, fmaps unused) is folded into the
    # packed constants consumed by the single fused kernel below.
    out_a, mano_slab = decoder_fused(x, packed)

    v3d = jnp.transpose(out_a[0:3].reshape(3, hb, V_OUT), (1, 2, 0))      # (2B, V_OUT, 3)
    t = out_a[3:6, :hb].T                                                  # (2B, 3)
    mano = jnp.transpose(
        mano_slab.reshape(3, hb, V_MANO_PAD)[:, :, :V_MANO], (1, 2, 0))    # (2B, V_MANO, 3)

    scale, trans2d, verts3d, verts2d = {}, {}, {}, {}
    result = {"verts3d": {}, "verts2d": {}}
    for i, hand in enumerate(["left", "right"]):
        sl = slice(i * bs, (i + 1) * bs)
        scale[hand] = t[sl, 0]
        trans2d[hand] = t[sl, 1:]
        verts3d[hand] = v3d[sl]
        verts2d[hand] = projection_batch(scale[hand], trans2d[hand], verts3d[hand])
        result["verts3d"][hand] = mano[sl]
        result["verts2d"][hand] = projection_batch(scale[hand], trans2d[hand], mano[sl])

    handDictList = [{"verts3d": verts3d, "verts2d": verts2d}]
    otherInfo = {"verts3d_MANO_list": {"left": [], "right": []},
                 "verts2d_MANO_list": {"left": [], "right": []}}
    paramsDict = {"scale": scale, "trans2d": trans2d}
    return result, paramsDict, handDictList, otherInfo


# ============================ deterministic params ===========================
def xavier(key, fan_in, fan_out):
    a = (6.0 / (fan_in + fan_out)) ** 0.5
    return jax.random.uniform(key, (fan_in, fan_out), jnp.float32, -a, a)


def make_params(key):
    ks = jax.random.split(key, 16)
    d = D_GF
    pool = jnp.kron(jnp.eye(V_OUT, dtype=jnp.float32),
                    jnp.full((1, V_IN // V_OUT), V_OUT / V_IN, jnp.float32))
    return {
        "W_gf_l": xavier(ks[0], GF_DIM, d), "b_gf_l": jnp.zeros((d,), jnp.float32),
        "gamma_l": jnp.ones((d,), jnp.float32), "beta_l": jnp.zeros((d,), jnp.float32),
        "W_gf_r": xavier(ks[1], GF_DIM, d), "b_gf_r": jnp.zeros((d,), jnp.float32),
        "gamma_r": jnp.ones((d,), jnp.float32), "beta_r": jnp.zeros((d,), jnp.float32),
        "pool": pool,                                       # (V_OUT, V_IN), rows sum to 1
        "W_dg": xavier(ks[2], GCN_IN[0], C_OUT),
        "b_dg": jnp.zeros((C_OUT,), jnp.float32),
        "w_avg": xavier(ks[3], V_OUT, 1)[:, 0],
        "b_avg": jnp.zeros((1,), jnp.float32),
        "W_params": xavier(ks[4], C_OUT, 3), "b_params": jnp.zeros((3,), jnp.float32),
        "W_coord": xavier(ks[5], C_OUT, 3), "b_coord": jnp.zeros((3,), jnp.float32),
        "W_up": xavier(ks[6], V_OUT, V_MANO).T,             # (V_MANO, V_OUT), no bias
        "pe_left": jax.random.uniform(ks[7], (V_IN, 3), jnp.float32) * 2 - 1,
        "pe_right": jax.random.uniform(ks[8], (V_IN, 3), jnp.float32) * 2 - 1,
    }


def pack_params(p):
    """One-time layout + exact-algebra transform of module weights into kernel layout."""
    f32 = jnp.float32
    d, dp = D_GF, DPAD

    def pad_rows(w):                               # (d, K) -> (dp, K)
        return jnp.pad(w, ((0, dp - d), (0, 0)))

    W_gfT = jnp.concatenate([pad_rows(p["W_gf_l"].T), pad_rows(p["W_gf_r"].T)], axis=0)
    b_gf = jnp.concatenate([jnp.pad(p["b_gf_l"], (0, dp - d)),
                            jnp.pad(p["b_gf_r"], (0, dp - d))])
    mask1 = jnp.concatenate([jnp.ones((d,), f32), jnp.zeros((dp - d,), f32)])
    mask = jnp.concatenate([mask1, mask1])

    W_dg = p["W_dg"]                               # (C_IN, C_OUT): rows 0:61 gf, 61:64 pe
    W_dg_g, W_dg_pe = W_dg[:d], W_dg[d:]

    def fold_gamma(gamma):                         # LayerNorm gamma folded -> (C_OUT, DPAD)
        return jnp.pad((W_dg_g * gamma[:, None]).T, ((0, 0), (0, dp - d)))
    W_dg2T = jnp.concatenate([fold_gamma(p["gamma_l"]), fold_gamma(p["gamma_r"])], axis=0)

    pool = p["pool"]                               # (V_OUT, V_IN)
    colsum = jnp.sum(pool, axis=1)                 # (V_OUT,)  (all ones for avg pool)
    Sel = jnp.kron(jnp.eye(HB, dtype=f32), colsum[None, :])            # (HB, HB*V_OUT)

    def pe_slab(pe, beta):                         # -> (C_OUT, V_OUT)
        pooled = pool @ pe                         # (V_OUT, 3)
        featT = W_dg_pe.T @ pooled.T               # (C_OUT, V_OUT)
        const = W_dg_g.T @ beta                    # exact LayerNorm-beta fold
        return featT + p["b_dg"][:, None] + const[:, None] * colsum[None, :]
    pe_bias = jnp.concatenate(
        [jnp.tile(pe_slab(p["pe_left"], p["beta_l"]), (1, BS)),
         jnp.tile(pe_slab(p["pe_right"], p["beta_r"]), (1, BS))], axis=1)  # (C_OUT, 128)

    W_h6T = jnp.concatenate([p["W_coord"].T, p["W_params"].T], axis=0)     # (6, C_OUT)
    # exact fold of the (linear) avg_head bias into the params head bias
    b_eff = p["b_avg"][0] * jnp.sum(p["W_params"], axis=0) + p["b_params"]

    def col_pad3(v):                               # (3,) -> (2*DPAD,)
        return jnp.pad(v, (0, 2 * dp - 3))
    zcol = jnp.zeros((2 * dp,), f32)
    P_cols = jnp.stack([b_gf, mask, col_pad3(p["b_coord"]), col_pad3(b_eff),
                        zcol, zcol, zcol, zcol], axis=1)                   # (128, 8)

    Wavg_blk = jnp.pad(jnp.kron(jnp.eye(HB, dtype=f32), p["w_avg"][:, None]),
                       ((0, 0), (0, HB * V_OUT - HB)))                     # (128, 128)

    WupT_pad = jnp.pad(p["W_up"].T, ((0, 0), (0, V_MANO_PAD - V_MANO)))    # (V_OUT, 96)
    Wup_blk = jnp.kron(jnp.eye(HB, dtype=f32), WupT_pad)                   # (128, 384)

    return {"W_gfT": W_gfT, "P_cols": P_cols, "W_dg2T": W_dg2T, "Sel": Sel,
            "pe_bias": pe_bias, "W_h6T": W_h6T, "Wavg_blk": Wavg_blk,
            "Wup_blk": Wup_blk}


# ===================== unfused pure-JAX reference (checking) =================
def decoder_ref(p, x):
    def gf_ln(W, b, gamma, beta):
        h = x @ W + b
        mu = jnp.mean(h, axis=-1, keepdims=True)
        var = jnp.mean(jnp.square(h - mu), axis=-1, keepdims=True)
        return (h - mu) / jnp.sqrt(var + LN_EPS) * gamma + beta

    g = {"left": gf_ln(p["W_gf_l"], p["b_gf_l"], p["gamma_l"], p["beta_l"]),
         "right": gf_ln(p["W_gf_r"], p["b_gf_r"], p["gamma_r"], p["beta_r"])}
    pe = {"left": p["pe_left"], "right": p["pe_right"]}
    pool = p["pool"]
    B = x.shape[0]
    out = {}
    for hand in ["left", "right"]:
        gf_vert = jnp.broadcast_to(g[hand][:, None, :], (B, V_IN, D_GF))
        pe_vert = jnp.broadcast_to(pe[hand][None], (B, V_IN, 3))
        Lf = jnp.concatenate([gf_vert, pe_vert], axis=-1)          # (B, V_IN, C_IN)
        pooled = jnp.einsum('ov,bvc->boc', pool, Lf)               # (B, V_OUT, C_IN)
        f1 = pooled @ p["W_dg"] + p["b_dg"]                        # (B, V_OUT, C_OUT)
        v3d = f1 @ p["W_coord"] + p["b_coord"]                     # (B, V_OUT, 3)
        a = jnp.einsum('bvc,v->bc', f1, p["w_avg"]) + p["b_avg"][0]
        t = a @ p["W_params"] + p["b_params"]                      # (B, 3)
        mano = jnp.einsum('bvk,mv->bmk', v3d, p["W_up"])           # (B, V_MANO, 3)
        out[hand] = (v3d, t, mano)
    return out


if __name__ == "__main__":
    key = jax.random.PRNGKey(0)
    kparam, kx, kf = jax.random.split(key, 3)
    params = make_params(kparam)
    packed = pack_params(params)

    x = jax.random.normal(kx, (BS, GF_DIM), jnp.float32)
    # fmaps like the backbone would give (NCHW); last entry dropped in forward.
    kfs = jax.random.split(kf, 4)
    fmaps = [jax.random.normal(kfs[0], (BS, 16, 8, 8), jnp.float32),
             jax.random.normal(kfs[1], (BS, 16, 16, 16), jnp.float32),
             jax.random.normal(kfs[2], (BS, 16, 32, 32), jnp.float32),
             jax.random.normal(kfs[3], (BS, 16, 64, 64), jnp.float32)]

    fwd = jax.jit(decoder_forward)
    result, paramsDict, handDictList, otherInfo = fwd(packed, x, fmaps)
    jax.block_until_ready(result["verts3d"]["left"])
    jax.block_until_ready(result["verts2d"]["right"])
    jax.block_until_ready(paramsDict["scale"]["left"])
    jax.block_until_ready(handDictList[0]["verts2d"]["right"])

    # shape checks
    assert result["verts3d"]["left"].shape == (BS, V_MANO, 3)
    assert result["verts2d"]["right"].shape == (BS, V_MANO, 2)
    assert handDictList[0]["verts3d"]["left"].shape == (BS, V_OUT, 3)
    assert paramsDict["trans2d"]["right"].shape == (BS, 2)

    # numerical check vs. the unfused pure-JAX reference of the same math
    # (loose tolerance: MXU default-precision matmul passes differ slightly)
    ref = decoder_ref(params, x)
    close = lambda a, b: bool(jnp.allclose(a, b, atol=5e-2, rtol=5e-2))
    for hand in ["left", "right"]:
        v3d_r, t_r, mano_r = ref[hand]
        assert close(handDictList[0]["verts3d"][hand], v3d_r), hand
        assert close(result["verts3d"][hand], mano_r), hand
        assert close(paramsDict["scale"][hand], t_r[:, 0]), hand
        assert close(paramsDict["trans2d"][hand], t_r[:, 1:]), hand

    print("KERNEL_OK")
</pallas_src>

<mosaic_0001>
module attributes {stable_mosaic.version = 11 : i64} {
  func.func @_decoder_fused_kernel(%arg0: i32, %arg1: memref<2x256xf32, #tpu.memory_space<vmem>>, %arg2: memref<128x256xf32, #tpu.memory_space<vmem>>, %arg3: memref<128x8xf32, #tpu.memory_space<vmem>>, %arg4: memref<64x64xf32, #tpu.memory_space<vmem>>, %arg5: memref<4x128xf32, #tpu.memory_space<vmem>>, %arg6: memref<32x128xf32, #tpu.memory_space<vmem>>, %arg7: memref<6x32xf32, #tpu.memory_space<vmem>>, %arg8: memref<128x128xf32, #tpu.memory_space<vmem>>, %arg9: memref<128x384xf32, #tpu.memory_space<vmem>>, %arg10: memref<6x128xf32, #tpu.memory_space<vmem>>, %arg11: memref<3x384xf32, #tpu.memory_space<vmem>>) attributes {dimension_semantics = [#tpu.dimension_semantics<arbitrary>], iteration_bounds = array<i64: 1>, scalar_prefetch = 0 : i64, scratch_operands = 0 : i64, tpu.core_type = #tpu.core_type<tc>, window_params = [{pipeline_mode = #tpu.pipeline_mode<synchronous>, transform_indices = @transform_0, window_bounds = array<i64: 2, 256>}, {pipeline_mode = #tpu.pipeline_mode<synchronous>, transform_indices = @transform_1, window_bounds = array<i64: 128, 256>}, {pipeline_mode = #tpu.pipeline_mode<synchronous>, transform_indices = @transform_2, window_bounds = array<i64: 128, 8>}, {pipeline_mode = #tpu.pipeline_mode<synchronous>, transform_indices = @transform_3, window_bounds = array<i64: 64, 64>}, {pipeline_mode = #tpu.pipeline_mode<synchronous>, transform_indices = @transform_4, window_bounds = array<i64: 4, 128>}, {pipeline_mode = #tpu.pipeline_mode<synchronous>, transform_indices = @transform_5, window_bounds = array<i64: 32, 128>}, {pipeline_mode = #tpu.pipeline_mode<synchronous>, transform_indices = @transform_6, window_bounds = array<i64: 6, 32>}, {pipeline_mode = #tpu.pipeline_mode<synchronous>, transform_indices = @transform_7, window_bounds = array<i64: 128, 128>}, {pipeline_mode = #tpu.pipeline_mode<synchronous>, transform_indices = @transform_8, window_bounds = array<i64: 128, 384>}, {pipeline_mode = #tpu.pipeline_mode<synchronous>, transform_indices = @transform_9, window_bounds = array<i64: 6, 128>}, {pipeline_mode = #tpu.pipeline_mode<synchronous>, transform_indices = @transform_10, window_bounds = array<i64: 3, 384>}]} {
    %c0 = arith.constant 0 : index
    %c0_0 = arith.constant 0 : index
    %0 = vector.load %arg3[%c0, %c0_0] : memref<128x8xf32, #tpu.memory_space<vmem>>, vector<128x8xf32>
    %c0_1 = arith.constant 0 : index
    %c0_2 = arith.constant 0 : index
    %1 = vector.load %arg2[%c0_1, %c0_2] : memref<128x256xf32, #tpu.memory_space<vmem>>, vector<128x256xf32>
    %c0_3 = arith.constant 0 : index
    %c0_4 = arith.constant 0 : index
    %2 = vector.load %arg1[%c0_3, %c0_4] : memref<2x256xf32, #tpu.memory_space<vmem>>, vector<2x256xf32>
    %cst = arith.constant dense<0.000000e+00> : vector<128x2xf32>
    %3 = tpu.matmul %1, %2, %cst {dimension_numbers = #tpu.dot_dimension_numbers<[1], [1], [0], [0], [0, 0, 1, 0], [], []>} : vector<128x256xf32>, vector<2x256xf32>, vector<128x2xf32> -> vector<128x2xf32>
    %4 = vector.extract_strided_slice %0 {offsets = [0, 0], sizes = [128, 1], strides = [1, 1]} : vector<128x8xf32> to vector<128x1xf32>
    %5 = vector.broadcast %4 : vector<128x1xf32> to vector<128x2xf32>
    %6 = arith.addf %3, %5 : vector<128x2xf32>
    %7 = vector.extract_strided_slice %0 {offsets = [0, 1], sizes = [128, 1], strides = [1, 1]} : vector<128x8xf32> to vector<128x1xf32>
    %8 = vector.extract_strided_slice %6 {offsets = [0, 0], sizes = [64, 2], strides = [1, 1]} : vector<128x2xf32> to vector<64x2xf32>
    %9 = vector.extract_strided_slice %7 {offsets = [0, 0], sizes = [64, 1], strides = [1, 1]} : vector<128x1xf32> to vector<64x1xf32>
    %cst_5 = arith.constant dense<0.000000e+00> : vector<2xf32>
    %10 = vector.multi_reduction <add>, %8, %cst_5 [0] : vector<64x2xf32> to vector<2xf32>
    %11 = vector.shape_cast %10 : vector<2xf32> to vector<1x2xf32>
    %cst_6 = arith.constant 0.0163934417 : f32
    %12 = vector.broadcast %cst_6 : f32 to vector<1x2xf32>
    %13 = arith.mulf %11, %12 : vector<1x2xf32>
    %14 = vector.broadcast %13 : vector<1x2xf32> to vector<64x2xf32>
    %15 = arith.subf %8, %14 : vector<64x2xf32>
    %16 = vector.broadcast %9 : vector<64x1xf32> to vector<64x2xf32>
    %17 = arith.mulf %15, %16 : vector<64x2xf32>
    %18 = arith.mulf %17, %17 : vector<64x2xf32>
    %cst_7 = arith.constant dense<0.000000e+00> : vector<2xf32>
    %19 = vector.multi_reduction <add>, %18, %cst_7 [0] : vector<64x2xf32> to vector<2xf32>
    %20 = vector.shape_cast %19 : vector<2xf32> to vector<1x2xf32>
    %cst_8 = arith.constant 0.0163934417 : f32
    %21 = vector.broadcast %cst_8 : f32 to vector<1x2xf32>
    %22 = arith.mulf %20, %21 : vector<1x2xf32>
    %cst_9 = arith.constant 9.99999997E-7 : f32
    %23 = vector.broadcast %cst_9 : f32 to vector<1x2xf32>
    %24 = arith.addf %22, %23 : vector<1x2xf32>
    %25 = math.rsqrt %24 : vector<1x2xf32>
    %26 = vector.broadcast %25 : vector<1x2xf32> to vector<64x2xf32>
    %27 = arith.mulf %17, %26 : vector<64x2xf32>
    %28 = vector.extract_strided_slice %6 {offsets = [64, 0], sizes = [64, 2], strides = [1, 1]} : vector<128x2xf32> to vector<64x2xf32>
    %29 = vector.extract_strided_slice %7 {offsets = [64, 0], sizes = [64, 1], strides = [1, 1]} : vector<128x1xf32> to vector<64x1xf32>
    %cst_10 = arith.constant dense<0.000000e+00> : vector<2xf32>
    %30 = vector.multi_reduction <add>, %28, %cst_10 [0] : vector<64x2xf32> to vector<2xf32>
    %31 = vector.shape_cast %30 : vector<2xf32> to vector<1x2xf32>
    %cst_11 = arith.constant 0.0163934417 : f32
    %32 = vector.broadcast %cst_11 : f32 to vector<1x2xf32>
    %33 = arith.mulf %31, %32 : vector<1x2xf32>
    %34 = vector.broadcast %33 : vector<1x2xf32> to vector<64x2xf32>
    %35 = arith.subf %28, %34 : vector<64x2xf32>
    %36 = vector.broadcast %29 : vector<64x1xf32> to vector<64x2xf32>
    %37 = arith.mulf %35, %36 : vector<64x2xf32>
    %38 = arith.mulf %37, %37 : vector<64x2xf32>
    %cst_12 = arith.constant dense<0.000000e+00> : vector<2xf32>
    %39 = vector.multi_reduction <add>, %38, %cst_12 [0] : vector<64x2xf32> to vector<2xf32>
    %40 = vector.shape_cast %39 : vector<2xf32> to vector<1x2xf32>
    %cst_13 = arith.constant 0.0163934417 : f32
    %41 = vector.broadcast %cst_13 : f32 to vector<1x2xf32>
    %42 = arith.mulf %40, %41 : vector<1x2xf32>
    %cst_14 = arith.constant 9.99999997E-7 : f32
    %43 = vector.broadcast %cst_14 : f32 to vector<1x2xf32>
    %44 = arith.addf %42, %43 : vector<1x2xf32>
    %45 = math.rsqrt %44 : vector<1x2xf32>
    %46 = vector.broadcast %45 : vector<1x2xf32> to vector<64x2xf32>
    %47 = arith.mulf %37, %46 : vector<64x2xf32>
    %c0_15 = arith.constant 0 : index
    %c0_16 = arith.constant 0 : index
    %48 = vector.load %arg4[%c0_15, %c0_16] : memref<64x64xf32, #tpu.memory_space<vmem>>, vector<64x64xf32>
    %49 = vector.extract_strided_slice %48 {offsets = [0, 0], sizes = [32, 64], strides = [1, 1]} : vector<64x64xf32> to vector<32x64xf32>
    %cst_17 = arith.constant dense<0.000000e+00> : vector<32x2xf32>
    %50 = tpu.matmul %49, %27, %cst_17 {dimension_numbers = #tpu.dot_dimension_numbers<[1], [0], [0], [1], [0, 0, 1, 1], [], []>} : vector<32x64xf32>, vector<64x2xf32>, vector<32x2xf32> -> vector<32x2xf32>
    %51 = vector.extract_strided_slice %48 {offsets = [32, 0], sizes = [32, 64], strides = [1, 1]} : vector<64x64xf32> to vector<32x64xf32>
    %cst_18 = arith.constant dense<0.000000e+00> : vector<32x2xf32>
    %52 = tpu.matmul %51, %47, %cst_18 {dimension_numbers = #tpu.dot_dimension_numbers<[1], [0], [0], [1], [0, 0, 1, 1], [], []>} : vector<32x64xf32>, vector<64x2xf32>, vector<32x2xf32> -> vector<32x2xf32>
    %53 = tpu.concatenate %50, %52 in 1 : vector<32x2xf32>, vector<32x2xf32> -> vector<32x4xf32>
    %c0_19 = arith.constant 0 : index
    %c0_20 = arith.constant 0 : index
    %54 = vector.load %arg5[%c0_19, %c0_20] : memref<4x128xf32, #tpu.memory_space<vmem>>, vector<4x128xf32>
    %cst_21 = arith.constant dense<0.000000e+00> : vector<32x128xf32>
    %55 = tpu.matmul %53, %54, %cst_21 {dimension_numbers = #tpu.dot_dimension_numbers<[1], [0], [0], [1], [0, 0, 1, 1], [], []>} : vector<32x4xf32>, vector<4x128xf32>, vector<32x128xf32> -> vector<32x128xf32>
    %c0_22 = arith.constant 0 : index
    %c0_23 = arith.constant 0 : index
    %56 = vector.load %arg6[%c0_22, %c0_23] : memref<32x128xf32, #tpu.memory_space<vmem>>, vector<32x128xf32>
    %57 = arith.addf %55, %56 : vector<32x128xf32>
    %c0_24 = arith.constant 0 : index
    %c0_25 = arith.constant 0 : index
    %58 = vector.load %arg7[%c0_24, %c0_25] : memref<6x32xf32, #tpu.memory_space<vmem>>, vector<6x32xf32>
    %cst_26 = arith.constant dense<0.000000e+00> : vector<6x128xf32>
    %59 = tpu.matmul %58, %57, %cst_26 {dimension_numbers = #tpu.dot_dimension_numbers<[1], [0], [0], [1], [0, 0, 1, 1], [], []>} : vector<6x32xf32>, vector<32x128xf32>, vector<6x128xf32> -> vector<6x128xf32>
    %60 = vector.extract_strided_slice %59 {offsets = [0, 0], sizes = [3, 128], strides = [1, 1]} : vector<6x128xf32> to vector<3x128xf32>
    %61 = vector.extract_strided_slice %0 {offsets = [0, 2], sizes = [3, 1], strides = [1, 1]} : vector<128x8xf32> to vector<3x1xf32>
    %62 = vector.broadcast %61 : vector<3x1xf32> to vector<3x128xf32>
    %63 = arith.addf %60, %62 : vector<3x128xf32>
    %64 = vector.extract_strided_slice %59 {offsets = [3, 0], sizes = [3, 128], strides = [1, 1]} : vector<6x128xf32> to vector<3x128xf32>
    %c0_27 = arith.constant 0 : index
    %c0_28 = arith.constant 0 : index
    %65 = vector.load %arg8[%c0_27, %c0_28] : memref<128x128xf32, #tpu.memory_space<vmem>>, vector<128x128xf32>
    %cst_29 = arith.constant dense<0.000000e+00> : vector<3x128xf32>
    %66 = tpu.matmul %64, %65, %cst_29 {dimension_numbers = #tpu.dot_dimension_numbers<[1], [0], [0], [1], [0, 0, 1, 1], [], []>} : vector<3x128xf32>, vector<128x128xf32>, vector<3x128xf32> -> vector<3x128xf32>
    %67 = vector.extract_strided_slice %0 {offsets = [0, 3], sizes = [3, 1], strides = [1, 1]} : vector<128x8xf32> to vector<3x1xf32>
    %68 = vector.broadcast %67 : vector<3x1xf32> to vector<3x128xf32>
    %69 = arith.addf %66, %68 : vector<3x128xf32>
    %70 = tpu.concatenate %63, %69 in 0 : vector<3x128xf32>, vector<3x128xf32> -> vector<6x128xf32>
    %c0_30 = arith.constant 0 : index
    %c0_31 = arith.constant 0 : index
    %71 = vector.load %arg10[%c0_30, %c0_31] : memref<6x128xf32, #tpu.memory_space<vmem>>, vector<6x128xf32>
    tpu.vector_store %arg10[%c0_30, %c0_31], %70 {strides = array<i32>} : memref<6x128xf32, #tpu.memory_space<vmem>>, vector<6x128xf32>,
    %c0_32 = arith.constant 0 : index
    %c0_33 = arith.constant 0 : index
    %72 = vector.load %arg9[%c0_32, %c0_33] : memref<128x384xf32, #tpu.memory_space<vmem>>, vector<128x384xf32>
    %cst_34 = arith.constant dense<0.000000e+00> : vector<3x384xf32>
    %73 = tpu.matmul %63, %72, %cst_34 {dimension_numbers = #tpu.dot_dimension_numbers<[1], [0], [0], [1], [0, 0, 1, 1], [], []>} : vector<3x128xf32>, vector<128x384xf32>, vector<3x384xf32> -> vector<3x384xf32>
    %c0_35 = arith.constant 0 : index
    %c0_36 = arith.constant 0 : index
    %74 = vector.load %arg11[%c0_35, %c0_36] : memref<3x384xf32, #tpu.memory_space<vmem>>, vector<3x384xf32>
    tpu.vector_store %arg11[%c0_35, %c0_36], %73 {strides = array<i32>} : memref<3x384xf32, #tpu.memory_space<vmem>>, vector<3x384xf32>,
    return
  }
  func.func @transform_0(%arg0: i32) -> (i32, i32) {
    %c0_i32 = arith.constant 0 : i32
    %c0_i32_0 = arith.constant 0 : i32
    %c0_i32_1 = arith.constant 0 : i32
    return %c0_i32, %c0_i32_0 : i32, i32
  }
  func.func @transform_1(%arg0: i32) -> (i32, i32) {
    %c0_i32 = arith.constant 0 : i32
    %c0_i32_0 = arith.constant 0 : i32
    %c0_i32_1 = arith.constant 0 : i32
    return %c0_i32, %c0_i32_0 : i32, i32
  }
  func.func @transform_2(%arg0: i32) -> (i32, i32) {
    %c0_i32 = arith.constant 0 : i32
    %c0_i32_0 = arith.constant 0 : i32
    %c0_i32_1 = arith.constant 0 : i32
    return %c0_i32, %c0_i32_0 : i32, i32
  }
  func.func @transform_3(%arg0: i32) -> (i32, i32) {
    %c0_i32 = arith.constant 0 : i32
    %c0_i32_0 = arith.constant 0 : i32
    %c0_i32_1 = arith.constant 0 : i32
    return %c0_i32, %c0_i32_0 : i32, i32
  }
  func.func @transform_4(%arg0: i32) -> (i32, i32) {
    %c0_i32 = arith.constant 0 : i32
    %c0_i32_0 = arith.constant 0 : i32
    %c0_i32_1 = arith.constant 0 : i32
    return %c0_i32, %c0_i32_0 : i32, i32
  }
  func.func @transform_5(%arg0: i32) -> (i32, i32) {
    %c0_i32 = arith.constant 0 : i32
    %c0_i32_0 = arith.constant 0 : i32
    %c0_i32_1 = arith.constant 0 : i32
    return %c0_i32, %c0_i32_0 : i32, i32
  }
  func.func @transform_6(%arg0: i32) -> (i32, i32) {
    %c0_i32 = arith.constant 0 : i32
    %c0_i32_0 = arith.constant 0 : i32
    %c0_i32_1 = arith.constant 0 : i32
    return %c0_i32, %c0_i32_0 : i32, i32
  }
  func.func @transform_7(%arg0: i32) -> (i32, i32) {
    %c0_i32 = arith.constant 0 : i32
    %c0_i32_0 = arith.constant 0 : i32
    %c0_i32_1 = arith.constant 0 : i32
    return %c0_i32, %c0_i32_0 : i32, i32
  }
  func.func @transform_8(%arg0: i32) -> (i32, i32) {
    %c0_i32 = arith.constant 0 : i32
    %c0_i32_0 = arith.constant 0 : i32
    %c0_i32_1 = arith.constant 0 : i32
    return %c0_i32, %c0_i32_0 : i32, i32
  }
  func.func @transform_9(%arg0: i32) -> (i32, i32) {
    %c0_i32 = arith.constant 0 : i32
    %c0_i32_0 = arith.constant 0 : i32
    %c0_i32_1 = arith.constant 0 : i32
    return %c0_i32, %c0_i32_0 : i32, i32
  }
  func.func @transform_10(%arg0: i32) -> (i32, i32) {
    %c0_i32 = arith.constant 0 : i32
    %c0_i32_0 = arith.constant 0 : i32
    %c0_i32_1 = arith.constant 0 : i32
    return %c0_i32, %c0_i32_0 : i32, i32
  }
}

</mosaic_0001>

<bundles_post_ra>
// kernel: decoder_forward.1
= control target key start
LH: loop header
LB: loop body
LE: loop exit
PB: predicated region body
PF: predicated region fallthrough
CT: control target
= control target key end

     0   :  { %16 = vsyncpa [#allocation3], 0  ;;  %s2309_s0 = inlined_call_operand.vmem [shape: f32[2,256], index: 0, kind: input, shape index: {}]   ;;  %s2310_s1 = inlined_call_operand.hbm [shape: f32[128,256], index: 1, kind: input, shape index: {}]   ;;  %s2311_s2 = inlined_call_operand.vmem [shape: f32[128,8], index: 2, kind: input, shape index: {}]   ;;  %s2312_s3 = inlined_call_operand.hbm [shape: f32[64,64], index: 3, kind: input, shape index: {}]   ;;  %s2313_s4 = inlined_call_operand.hbm [shape: f32[4,128], index: 4, kind: input, shape index: {}]   ;;  %s2314_s5 = inlined_call_operand.vmem [shape: f32[32,128], index: 5, kind: input, shape index: {}]   ;;  %s2315_s6 = inlined_call_operand.hbm [shape: f32[6,32], index: 6, kind: input, shape index: {}]   ;;  %s2316_s7 = inlined_call_operand.vmem [shape: f32[128,128], index: 7, kind: input, shape index: {}]   ;;  %s2317_s8 = inlined_call_operand.hbm [shape: f32[128,384], index: 8, kind: input, shape index: {}]   ;;  %s2318_s9 = inlined_call_operand.vmem [shape: f32[6,128], index: 9, kind: output, shape index: {0}]   ;;  %s2319_s10 = inlined_call_operand.vmem [shape: f32[3,384], index: 10, kind: output, shape index: {1}]  }
   0x1   :  { %17 = vsyncpa [#allocation5], 0 }
   0x2   :  { %18 = vsyncpa [#allocation8], 0  ;;  %s1801_s13 = smov [#allocation4]   ;;  %s1685_s17 = scalar_lea.hbm %s2312_s3, 1024 }
   0x3   :  { %s40_s14 = sshll.u32 %s1801_s13, 4  ;;  %p1686_p0 = scmp.ne.s32.totalorder %s2312_s3, %s1685_s17  ;;  %s41_s14 = int_to_ptr.vmem [resolvable:$true] %s40_s14 }
   0x4   :  { %p1689_p1 = scmp.lt.u32.totalorder %s1685_s17, %s2312_s3 }
   0x6   :  { %p1691_p2 = pnand %p1689_p1, %p1686_p0 }
   0x8   :  { %1694 = shalt.err (!%p1691_p2)
}
   0x9   :  { %s1695_s22 = scalar_lea.vmem %s41_s14, 1024  ;;  %p1700_p4 = scmp.lt.s32.totalorder %s41_s14, %s41_s14 }
   0xa   :  { %p1696_p3 = scmp.ne.s32.totalorder %s41_s14, %s1695_s22  ;;  %p1701_p5 = scmp.lt.s32.totalorder %s1695_s22, %s1695_s22 }
   0xc   :  { %p1702_p6 = por %p1701_p5, %p1700_p4 }
   0xe   :  { %p1703_p7 = pnand %p1702_p6, %p1696_p3 }
  0x10   :  { %1706 = shalt.err (!%p1703_p7)
}
  0x11   :  { %s1802_s23 = smov 128   ;;  %s1803_s24 = smov 8  }
  0x12   :  { %46 = dma.hbm_to_vmem [thread:$0]  %s2312_s3, 1024, %s41_s14, [#allocation5], %s1802_s23, %s1802_s23, %s1803_s24  }
  0x13   :  { %s1804_s27 = smov [#allocation7]   ;;  %s1805_s29 = smov [#allocation2]  }
  0x14   :  { %s65_s28 = sshll.u32 %s1804_s27, 4  ;;  %s26_s30 = sshll.u32 %s1805_s29, 4  ;;  %s66_s28 = int_to_ptr.vmem [resolvable:$true] %s65_s28  ;;  %s27_s30 = int_to_ptr.vmem [resolvable:$true] %s26_s30 }
  0x15   :  { %s1707_s13 = scalar_lea.hbm %s2315_s6, 128 }
  0x16   :  { %p1708_p8 = scmp.ne.s32.totalorder %s2315_s6, %s1707_s13  ;;  %p1711_p9 = scmp.lt.u32.totalorder %s1707_s13, %s2315_s6 }
  0x18   :  { %p1713_p10 = pnand %p1711_p9, %p1708_p8 }
  0x1a   :  { %1716 = shalt.err (!%p1713_p10)
}
  0x1b   :  { %s1717_s3 = scalar_lea.vmem %s66_s28, 128  ;;  %p1722_p12 = scmp.lt.s32.totalorder %s66_s28, %s66_s28 }
  0x1c   :  { %p1718_p11 = scmp.ne.s32.totalorder %s66_s28, %s1717_s3  ;;  %p1723_p13 = scmp.lt.s32.totalorder %s1717_s3, %s1717_s3 }
  0x1e   :  { %p1724_p0 = por %p1723_p13, %p1722_p12 }
  0x20   :  { %p1725_p1 = pnand %p1724_p0, %p1718_p11 }
  0x22   :  { %1728 = shalt.err (!%p1725_p1)
}
  0x23   :  { %68 = dma.hbm_to_vmem [thread:$0]  %s2315_s6, 128, %s66_s28, [#allocation8]  }
  0x24   :  { %s1729_s22 = scalar_lea.hbm %s2310_s1, 4096 }
  0x25   :  { %p1730_p2 = scmp.ne.s32.totalorder %s2310_s1, %s1729_s22  ;;  %p1733_p3 = scmp.lt.u32.totalorder %s1729_s22, %s2310_s1 }
  0x27   :  { %p1735_p4 = pnand %p1733_p3, %p1730_p2 }
  0x29   :  { %1738 = shalt.err (!%p1735_p4)
}
  0x2a   :  { %s1739_s27 = scalar_lea.vmem %s27_s30, 4096  ;;  %p1744_p6 = scmp.lt.s32.totalorder %s27_s30, %s27_s30 }
  0x2b   :  { %p1740_p5 = scmp.ne.s32.totalorder %s27_s30, %s1739_s27  ;;  %p1745_p7 = scmp.lt.s32.totalorder %s1739_s27, %s1739_s27 }
  0x2d   :  { %p1746_p8 = por %p1745_p7, %p1744_p6 }
  0x2f   :  { %p1747_p9 = pnand %p1746_p8, %p1740_p5 }
  0x31   :  { %1750 = shalt.err (!%p1747_p9)
}
  0x32   :  { %s1806_s6 = smov 256   ;;  %s1807_s28 = smov 16  }
  0x33   :  { %32 = dma.hbm_to_vmem [thread:$0]  %s2310_s1, 4096, %s27_s30, [#allocation3], %s1806_s6, %s1806_s6, %s1807_s28  }
  0x34   :  { %s1808_s12 = smov [#allocation6]   ;;  %s1809_s15 = smov [#allocation9]  }
  0x35   :  { %s53_s13 = sshll.u32 %s1808_s12, 4  ;;  %s76_s16 = sshll.u32 %s1809_s15, 4  ;;  %s54_s13 = int_to_ptr.vmem [resolvable:$true] %s53_s13  ;;  %s77_s16 = int_to_ptr.vmem [resolvable:$true] %s76_s16 }
  0x36   :  { %s1751_s3 = scalar_lea.hbm %s2313_s4, 64 }
  0x37   :  { %p1752_p10 = scmp.ne.s32.totalorder %s2313_s4, %s1751_s3  ;;  %p1755_p11 = scmp.lt.u32.totalorder %s1751_s3, %s2313_s4 }
  0x39   :  { %p1757_p12 = pnand %p1755_p11, %p1752_p10 }
  0x3b   :  { %1760 = shalt.err (!%p1757_p12)
}
  0x3c   :  { %s1761_s1 = scalar_lea.vmem %s54_s13, 64  ;;  %p1766_p0 = scmp.lt.s32.totalorder %s54_s13, %s54_s13 }
  0x3d   :  { %p1762_p13 = scmp.ne.s32.totalorder %s54_s13, %s1761_s1  ;;  %p1767_p1 = scmp.lt.s32.totalorder %s1761_s1, %s1761_s1 }
  0x3f   :  { %p1768_p2 = por %p1767_p1, %p1766_p0 }
  0x41   :  { %p1769_p3 = pnand %p1768_p2, %p1762_p13 }
  0x43   :  { %1772 = shalt.err (!%p1769_p3)
}
  0x44   :  { %56 = dma.hbm_to_vmem [thread:$0]  %s2313_s4, 64, %s54_s13, [#allocation5]  }
  0x45   :  { %s1773_s25 = scalar_lea.hbm %s2317_s8, 6144 }
  0x46   :  { %p1774_p4 = scmp.ne.s32.totalorder %s2317_s8, %s1773_s25  ;;  %p1777_p5 = scmp.lt.u32.totalorder %s1773_s25, %s2317_s8 }
  0x48   :  { %p1779_p6 = pnand %p1777_p5, %p1774_p4 }
  0x4a   :  { %1782 = shalt.err (!%p1779_p6)
}
  0x4b   :  { %s1783_s29 = scalar_lea.vmem %s77_s16, 6144  ;;  %p1788_p8 = scmp.lt.s32.totalorder %s77_s16, %s77_s16 }
  0x4c   :  { %p1784_p7 = scmp.ne.s32.totalorder %s77_s16, %s1783_s29  ;;  %p1789_p9 = scmp.lt.s32.totalorder %s1783_s29, %s1783_s29 }
  0x4e   :  { %p1790_p10 = por %p1789_p9, %p1788_p8 }
  0x50   :  { %p1791_p11 = pnand %p1790_p10, %p1784_p7 }
  0x52   :  { %1794 = shalt.err (!%p1791_p11)
}
  0x53   :  { %s1810_s4 = smov 384   ;;  %s1811_s11 = smov 24  }
  0x54   :  { %82 = dma.hbm_to_vmem [thread:$0]  %s2317_s8, 6144, %s77_s16, [#allocation8], %s1810_s4, %s1810_s4, %s1811_s11  }
  0x55   :  { %1795 = dma.done.wait [#allocation3], 4096  }
  0x56   :  { %1796 = vsyncadd [#allocation3], 4294963200 }
  0x57   :  { %1797 = dma.done.wait [#allocation5], 1088  }
  0x58   :  { %1798 = vsyncadd [#allocation5], 4294966208 }
  0x59   :  { %1799 = dma.done.wait [#allocation8], 6272  }
  0x5a   :  { %1800 = vsyncadd [#allocation8], 4294961024  ;;  %v1812_v0 = vmov 0   ;;  %v115_v2 = vld [vmem:[#allocation2 + $0x8] sm:$0xff]  ;;  %v114_v5 = vld [vmem:[#allocation2] sm:$0xff]  ;;  %v1813_v50 = vmov 1  }
  0x5b   :  { %1674 = vset.pattern.permute.xlu0 %v1812_v0  ;;  %1675 = vset.pattern.permute.xlu1 %v1812_v0  ;;  %v1319_v1 = vld.sshfl [vmem:[%s2309_s0] sm:$0x33 pattern:$0x76325410]  ;;  %v139_v4 = vld [vmem:[#allocation2 + $0xc8] sm:$0xff]  ;;  %v117_v7 = vld [vmem:[#allocation2 + $0x18] sm:$0xff] }
  0x5c   :  { %v235_v3 = vcombine.high %v1319_v1, %v1319_v1  ;;  %302 = vmatprep.mubr.f32.mxu0 %v115_v2  ;;  %v138_v6 = vld [vmem:[#allocation2 + $0xc0] sm:$0xff]  ;;  %362 = vmatprep.mubr.f32.mxu1 %v139_v4  ;;  %v141_v8 = vld [vmem:[#allocation2 + $0xd8] sm:$0xff]  ;;  %v116_v9 = vld [vmem:[#allocation2 + $0x10] sm:$0xff]  ;;  %vm612_vm0 = vcmask 523264   ;;  %vm383_vm1 = vcmask 15360   ;;  %vm845_vm2 = vcmask 1043456  }
  0x5d   :  { %v140_v10 = vld [vmem:[#allocation2 + $0xd0] sm:$0xff]  ;;  %v119_v11 = vld [vmem:[#allocation2 + $0x28] sm:$0xff]  ;;  %v1941_v13 = vld [vmem:[%s2311_s2] sm:$0xff]  ;;  %s1814_s19 = smov 2   ;;  %vm832_vm3 = vcmask 31744   ;;  %vm1816_vm4 = vmmov 0  }
  0x5e   :  { %238 = vmatprep.subr.mxu0 %v235_v3  ;;  %1653 = vmatprep.subr.mxu1 %v235_v3  ;;  %v143_v12 = vld [vmem:[#allocation2 + $0xe8] sm:$0xff]  ;;  %v1946_v14 = vld [vmem:[%s2311_s2 + $0x10] sm:$0xff]  ;;  %v118_v15 = vld [vmem:[#allocation2 + $0x20] sm:$0xff]  ;;  %vm935_vm5 = vcmask 261120   ;;  %vm1110_vm6 = vcmask 1042432  }
  0x5f   :  { %239 = vmatpush1.xpose.msra.mxu0 %v1319_v1  ;;  %1654 = vmatpush1.xpose.msra.mxu1 %v1319_v1  ;;  %v142_v16 = vld [vmem:[#allocation2 + $0xe0] sm:$0xff]  ;;  %v121_v17 = vld [vmem:[#allocation2 + $0x38] sm:$0xff]  ;;  %v1953_v19 = vld [vmem:[%s2311_s2 + $0x8] sm:$0xff] }
  0x60   :  { %v145_v18 = vld [vmem:[#allocation2 + $0xf8] sm:$0xff]  ;;  %149 = vperm.xlu0 %1674, %v1941_v13   ;;  %159 = vperm.xlu1 %1675, %v1946_v14   ;;  %v120_v21 = vld [vmem:[#allocation2 + $0x30] sm:$0xff]  ;;  %v123_v23 = vld [vmem:[#allocation2 + $0x48] sm:$0xff] }
  0x61   :  { %v1958_v20 = vld [vmem:[%s2311_s2 + $0x18] sm:$0xff]  ;;  %v144_v22 = vld [vmem:[#allocation2 + $0xf0] sm:$0xff]  ;;  %v1965_v24 = vld [vmem:[%s2311_s2 + $0x20] sm:$0xff] }
  0x62   :  { %303 = vmatmul.mubr.f32.vlgmr.msra.gmra.mrb[0].mxu0 %v114_v5  ;;  %363 = vmatmul.mubr.f32.vlgmr.msra.gmra.mrb[0].mxu1 %v138_v6  ;;  %v1970_v25 = vld [vmem:[%s2311_s2 + $0x28] sm:$0xff]  ;;  %v122_v26 = vld [vmem:[#allocation2 + $0x40] sm:$0xff]  ;;  %v125_v27 = vld [vmem:[#allocation2 + $0x58] sm:$0xff] }
  0x63   :  { %307 = vmatprep.mubr.f32.mxu0 %v117_v7  ;;  %367 = vmatprep.mubr.f32.mxu1 %v141_v8  ;;  %v104_v28 = vld [vmem:[%s2311_s2 + $0x30] sm:$0xff]  ;;  %v105_v29 = vld [vmem:[%s2311_s2 + $0x38] sm:$0xff]  ;;  %v127_v31 = vld [vmem:[#allocation2 + $0x68] sm:$0xff] }
  0x64   :  { %154 = vperm.xlu0 %1674, %v1953_v19   ;;  %164 = vperm.xlu1 %1675, %v1958_v20   ;;  %v124_v30 = vld [vmem:[#allocation2 + $0x50] sm:$0xff]  ;;  %v106_v32 = vld [vmem:[%s2311_s2 + $0x40] sm:$0xff]  ;;  %v107_v33 = vld [vmem:[%s2311_s2 + $0x48] sm:$0xff] }
  0x65   :  { %v126_v34 = vld [vmem:[#allocation2 + $0x60] sm:$0xff]  ;;  %v129_v35 = vld [vmem:[#allocation2 + $0x78] sm:$0xff]  ;;  %v108_v36 = vld [vmem:[%s2311_s2 + $0x50] sm:$0xff] }
  0x66   :  { %308 = vmatmul.mubr.f32.gmra.mrb[2].mxu0 %v116_v9  ;;  %368 = vmatmul.mubr.f32.gmra.mrb[2].mxu1 %v140_v10  ;;  %v109_v37 = vld [vmem:[%s2311_s2 + $0x58] sm:$0xff]  ;;  %v128_v38 = vld [vmem:[#allocation2 + $0x70] sm:$0xff]  ;;  %v131_v39 = vld [vmem:[#allocation2 + $0x88] sm:$0xff] }
  0x67   :  { %312 = vmatprep.mubr.f32.mxu0 %v119_v11  ;;  %372 = vmatprep.mubr.f32.mxu1 %v143_v12  ;;  %v110_v40 = vld [vmem:[%s2311_s2 + $0x60] sm:$0xff]  ;;  %v111_v41 = vld [vmem:[%s2311_s2 + $0x68] sm:$0xff]  ;;  %v133_v43 = vld [vmem:[#allocation2 + $0x98] sm:$0xff] }
  0x68   :  { %169 = vperm.xlu0 %1674, %v1965_v24   ;;  %174 = vperm.xlu1 %1675, %v1970_v25   ;;  %v130_v42 = vld [vmem:[#allocation2 + $0x80] sm:$0xff]  ;;  %v112_v44 = vld [vmem:[%s2311_s2 + $0x70] sm:$0xff]  ;;  %v113_v45 = vld [vmem:[%s2311_s2 + $0x78] sm:$0xff] }
  0x69   :  { %v132_v46 = vld [vmem:[#allocation2 + $0x90] sm:$0xff]  ;;  %v135_v47 = vld [vmem:[#allocation2 + $0xa8] sm:$0xff]  ;;  %v134_v48 = vld [vmem:[#allocation2 + $0xa0] sm:$0xff] }
  0x6a   :  { %313 = vmatmul.mubr.f32.gmra.mrb[4].mxu0 %v118_v15  ;;  %373 = vmatmul.mubr.f32.gmra.mrb[4].mxu1 %v142_v16  ;;  %v137_v49 = vld [vmem:[#allocation2 + $0xb8] sm:$0xff]  ;;  %v136_v51 = vld [vmem:[#allocation2 + $0xb0] sm:$0xff]  ;;  %v604_v59 = vld [vmem:[#allocation4] sm:$0xff] }
  0x6b   :  { %317 = vmatprep.mubr.f32.mxu0 %v121_v17  ;;  %377 = vmatprep.mubr.f32.mxu1 %v145_v18 }
  0x6c   :  { %179 = vperm.xlu0 %1674, %v104_v28   ;;  %184 = vperm.xlu1 %1675, %v105_v29  }
  0x6e   :  { %318 = vmatmul.mubr.f32.gmra.mrb[6].mxu0 %v120_v21  ;;  %378 = vmatmul.mubr.f32.gmra.mrb[6].mxu1 %v144_v22 }
  0x6f   :  { %322 = vmatprep.mubr.f32.mxu0 %v123_v23  ;;  %1418 = vmatprep.mubr.msk.f32.mxu1 %vm612_vm0, %v604_v59 }
  0x70   :  { %189 = vperm.xlu0 %1674, %v106_v32   ;;  %194 = vperm.xlu1 %1675, %v107_v33  }
  0x72   :  { %323 = vmatmul.mubr.f32.gmra.mrb[8].mxu0 %v122_v26 }
  0x73   :  { %327 = vmatprep.mubr.f32.mxu0 %v125_v27 }
  0x74   :  { %199 = vperm.xlu0 %1674, %v108_v36   ;;  %204 = vperm.xlu1 %1675, %v109_v37  }
  0x76   :  { %328 = vmatmul.mubr.f32.gmra.mrb[10].mxu0 %v124_v30 }
  0x77   :  { %332 = vmatprep.mubr.f32.mxu0 %v127_v31 }
  0x78   :  { %209 = vperm.xlu0 %1674, %v110_v40   ;;  %214 = vperm.xlu1 %1675, %v111_v41  }
  0x7a   :  { %333 = vmatmul.mubr.f32.gmra.mrb[12].mxu0 %v126_v34 }
  0x7b   :  { %337 = vmatprep.mubr.f32.mxu0 %v129_v35 }
  0x7c   :  { %219 = vperm.xlu0 %1674, %v112_v44   ;;  %224 = vperm.xlu1 %1675, %v113_v45  }
  0x7e   :  { %338 = vmatmul.mubr.f32.gmra.mrb[14].mxu0 %v128_v38 }
  0x7f   :  { %342 = vmatprep.mubr.f32.mxu0 %v131_v39 }
  0x80   :  { %1677 = vset.pattern.permute.xlu1 %v1813_v50  ;;  %1676 = vset.pattern.permute.xlu0 %v1813_v50 }
  0x81   :  { %419 = vperm.xlu1 %1677, %v1953_v19   ;;  %415 = vperm.xlu0 %1676, %v1941_v13  }
  0x82   :  { %343 = vmatmul.mubr.f32.gmra.mrb[16].mxu0 %v130_v42 }
  0x83   :  { %347 = vmatprep.mubr.f32.mxu0 %v133_v43 }
  0x85   :  { %423 = vperm.xlu1 %1677, %v1946_v14   ;;  %427 = vperm.xlu0 %1676, %v1958_v20  }
  0x86   :  { %348 = vmatmul.mubr.f32.gmra.mrb[18].mxu0 %v132_v46 }
  0x87   :  { %352 = vmatprep.mubr.f32.mxu0 %v135_v47 }
  0x89   :  { %431 = vperm.xlu1 %1677, %v1965_v24   ;;  %435 = vperm.xlu0 %1676, %v1970_v25  }
  0x8a   :  { %353 = vmatmul.mubr.f32.gmra.mrb[20].mxu0 %v134_v48 }
  0x8b   :  { %357 = vmatprep.mubr.f32.mxu0 %v137_v49 }
  0x8d   :  { %439 = vperm.xlu1 %1677, %v104_v28   ;;  %443 = vperm.xlu0 %1676, %v105_v29  }
  0x8e   :  { %358 = vmatmul.mubr.f32.gmra.mrb[22].mxu0 %v136_v51 }
  0x91   :  { %525 = vperm.xlu1 %1677, %v106_v32   ;;  %529 = vperm.xlu0 %1676, %v107_v33  }
  0x95   :  { %533 = vperm.xlu1 %1677, %v108_v36   ;;  %537 = vperm.xlu0 %1676, %v109_v37  }
  0x99   :  { %541 = vperm.xlu1 %1677, %v110_v40   ;;  %545 = vperm.xlu0 %1676, %v111_v41  }
  0x9d   :  { %549 = vperm.xlu1 %1677, %v112_v44   ;;  %553 = vperm.xlu0 %1676, %v113_v45  }
  0xdf   :  { %v160_v52 = vpop.permute.xlu1 %159  ;;  %v150_v53 = vpop.permute.xlu0 %149 }
  0xe3   :  { %v165_v54 = vpop.permute.xlu1 %164  ;;  %v155_v55 = vpop.permute.xlu0 %154 }
  0xe7   :  { %v175_v56 = vpop.permute.xlu1 %174  ;;  %v170_v63 = vpop.permute.xlu0 %169 }
  0xeb   :  { %v185_v0 = vpop.permute.xlu1 %184  ;;  %v180_v15 = vpop.permute.xlu0 %179 }
  0xef   :  { %v195_v17 = vpop.permute.xlu1 %194  ;;  %v190_v27 = vpop.permute.xlu0 %189 }
  0xf3   :  { %v205_v30 = vpop.permute.xlu1 %204  ;;  %v200_v36 = vpop.permute.xlu0 %199 }
  0xf7   :  { %v2043_v40 = vpop.permute.xlu1 %214  ;;  %v210_v46 = vpop.permute.xlu0 %209 }
  0xfb   :  { %v2051_v49 = vpop.permute.xlu1 %224 }
 0x135   :  { %v304_v57 = vpop.f32.mrb[0].mxu0  ;;  %v2010_v58 = vpop.f32.mrb[0].mxu1 }
 0x136   :  { %v306_v60 = vpop.f32.mrb[1].mxu0  ;;  %v366_v61 = vpop.f32.mrb[1].mxu1  ;;  %v2013_v62 = vadd.f32 %v304_v57, %v150_v53 }
 0x137   :  { %v420_v60 = vpop.permute.xlu1 %419 }
 0x138   :  { %v384_v6 = vsel %vm383_vm1, %v2013_v62, 0.0 }
 0x139   :  { %v309_v1 = vpop.f32.mrb[2].mxu0  ;;  %v2015_v2 = vpop.f32.mrb[2].mxu1 }
 0x13a   :  { %v2017_v3 = vadd.f32 %v309_v1, %v155_v55  ;;  %v311_v4 = vpop.f32.mrb[3].mxu0  ;;  %v371_v5 = vpop.f32.mrb[3].mxu1 }
 0x13b   :  { %v220_v55 = vpop.permute.xlu0 %219 }
 0x13c   :  { %v385_v7 = vsel %vm383_vm1, %v2017_v3, 0.0 }
 0x13d   :  { %v386_v8 = vadd.f32 %v385_v7, %v384_v6  ;;  %v314_v9 = vpop.f32.mrb[4].mxu0  ;;  %v2023_v10 = vpop.f32.mrb[4].mxu1 }
 0x13e   :  { %v2025_v11 = vadd.f32 %v314_v9, %v160_v52  ;;  %v316_v12 = vpop.f32.mrb[5].mxu0  ;;  %v376_v14 = vpop.f32.mrb[5].mxu1 }
 0x13f   :  { %v416_v1 = vpop.permute.xlu0 %415 }
 0x140   :  { %v387_v16 = vsel %vm383_vm1, %v2025_v11, 0.0 }
 0x141   :  { %v388_v18 = vadd.f32 %v387_v16, %v386_v8  ;;  %v319_v19 = vpop.f32.mrb[6].mxu0  ;;  %v2029_v20 = vpop.f32.mrb[6].mxu1 }
 0x142   :  { %v2031_v21 = vadd.f32 %v319_v19, %v165_v54  ;;  %v321_v22 = vpop.f32.mrb[7].mxu0  ;;  %v381_v23 = vpop.f32.mrb[7].mxu1 }
 0x143   :  { %v428_v22 = vpop.permute.xlu0 %427 }
 0x144   :  { %v389_v24 = vsel %vm383_vm1, %v2031_v21, 0.0 }
 0x145   :  { %v390_v25 = vadd.f32 %v389_v24, %v388_v18  ;;  %v324_v26 = vpop.f32.mrb[8].mxu0 }
 0x146   :  { %v2035_v28 = vadd.f32 %v324_v26, %v170_v63  ;;  %v326_v29 = vpop.f32.mrb[9].mxu0 }
 0x148   :  { %v391_v31 = vsel %vm383_vm1, %v2035_v28, 0.0 }
 0x149   :  { %v392_v32 = vadd.f32 %v391_v31, %v390_v25  ;;  %v329_v33 = vpop.f32.mrb[10].mxu0 }
 0x14a   :  { %v2039_v34 = vadd.f32 %v329_v33, %v175_v56  ;;  %v331_v35 = vpop.f32.mrb[11].mxu0 }
 0x14c   :  { %v393_v37 = vsel %vm383_vm1, %v2039_v34, 0.0 }
 0x14d   :  { %v394_v38 = vadd.f32 %v393_v37, %v392_v32  ;;  %v334_v39 = vpop.f32.mrb[12].mxu0 }
 0x14e   :  { %v2045_v41 = vadd.f32 %v334_v39, %v180_v15  ;;  %v336_v42 = vpop.f32.mrb[13].mxu0  ;;  %v424_v15 = vpop.permute.xlu1 %423 }
 0x150   :  { %v395_v43 = vsel %vm383_vm1, %v2045_v41, 0.0 }
 0x151   :  { %v396_v44 = vadd.f32 %v395_v43, %v394_v38  ;;  %v339_v45 = vpop.f32.mrb[14].mxu0 }
 0x152   :  { %v2049_v47 = vadd.f32 %v339_v45, %v185_v0  ;;  %v341_v48 = vpop.f32.mrb[15].mxu0  ;;  %v432_v32 = vpop.permute.xlu1 %431 }
 0x153   :  { %v2106_v48 = vadd.f32 %v2015_v2, %v2043_v40 }
 0x154   :  { %v397_v50 = vsel %vm383_vm1, %v2049_v47, 0.0 }
 0x155   :  { %v398_v51 = vadd.f32 %v397_v50, %v396_v44  ;;  %v344_v52 = vpop.f32.mrb[16].mxu0 }
 0x156   :  { %v346_v53 = vpop.f32.mrb[17].mxu0  ;;  %v2055_v56 = vadd.f32 %v344_v52, %v190_v27 }
 0x157   :  { %v399_v54 = vrot.slane %v398_v51, 4 }
 0x158   :  { %v494_v4 = vsel %vm383_vm1, %v2055_v56, 0.0 }
 0x159   :  { %v400_v57 = vadd.f32 %v399_v54, %v398_v51  ;;  %v349_v59 = vpop.f32.mrb[18].mxu0  ;;  %v440_v51 = vpop.permute.xlu1 %439 }
 0x15a   :  { %v2057_v61 = vadd.f32 %v349_v59, %v195_v17  ;;  %v351_v63 = vpop.f32.mrb[19].mxu0 }
 0x15b   :  { %v401_v0 = vrot.slane %v400_v57, 2 }
 0x15c   :  { %v495_v5 = vsel %vm383_vm1, %v2057_v61, 0.0 }
 0x15d   :  { %v402_v6 = vadd.f32 %v401_v0, %v400_v57  ;;  %v496_v7 = vadd.f32 %v495_v5, %v494_v4  ;;  %v354_v8 = vpop.f32.mrb[20].mxu0  ;;  %v2116_v57 = vadd.f32 %v2023_v10, %v220_v55  ;;  %v2127_v4 = vadd.f32 %v2029_v20, %v2051_v49 }
 0x15e   :  { %v2063_v9 = vadd.f32 %v354_v8, %v200_v36  ;;  %v356_v12 = vpop.f32.mrb[21].mxu0 }
 0x15f   :  { %v403_v14 = vrot.slane %v402_v6, 1  ;;  %v507_v20 = vsel %vm383_vm1, %v2127_v4, 0.0 }
 0x160   :  { %v497_v16 = vsel %vm383_vm1, %v2063_v9, 0.0 }
 0x161   :  { %v404_v17 = vadd.f32 %v403_v14, %v402_v6  ;;  %v498_v18 = vadd.f32 %v497_v16, %v496_v7  ;;  %v359_v19 = vpop.f32.mrb[22].mxu0  ;;  %v505_v7 = vsel %vm383_vm1, %v2116_v57, 0.0 }
 0x162   :  { %v361_v23 = vpop.f32.mrb[23].mxu0  ;;  %v2067_v25 = vadd.f32 %v359_v19, %v205_v30 }
 0x163   :  { %v405_v24 = vmul.f32 0.016393442, %v404_v17 }
 0x164   :  { %v499_v42 = vsel %vm383_vm1, %v2067_v25, 0.0 }
 0x165   :  { %v406_v26 = vsub.f32 %v2013_v62, %v405_v24  ;;  %v407_v27 = vsub.f32 %v2017_v3, %v405_v24  ;;  %v408_v29 = vsub.f32 %v2025_v11, %v405_v24  ;;  %v409_v31 = vsub.f32 %v2031_v21, %v405_v24  ;;  %v436_v11 = vpop.permute.xlu0 %435 }
 0x166   :  { %v410_v33 = vsub.f32 %v2035_v28, %v405_v24  ;;  %v411_v35 = vsub.f32 %v2039_v34, %v405_v24  ;;  %v412_v36 = vsub.f32 %v2045_v41, %v405_v24  ;;  %v413_v37 = vsub.f32 %v2049_v47, %v405_v24  ;;  %v526_v24 = vpop.permute.xlu1 %525 }
 0x167   :  { %v2077_v38 = vmul.f32 %v420_v60, %v407_v27  ;;  %v2079_v30 = vmul.f32 %v416_v1, %v406_v26  ;;  %v2081_v62 = vmul.f32 %v424_v15, %v408_v29  ;;  %v2083_v3 = vmul.f32 %v428_v22, %v409_v31 }
 0x168   :  { %v2091_v39 = vmul.f32 %v432_v32, %v410_v33  ;;  %v2094_v41 = vadd.f32 %v2010_v58, %v210_v46  ;;  %v2102_v47 = vmul.f32 %v436_v11, %v411_v35  ;;  %v2111_v52 = vmul.f32 %v440_v51, %v412_v36 }
 0x169   :  { %v455_v21 = vmul.f32 %v2077_v38, %v2077_v38  ;;  %v454_v28 = vmul.f32 %v2079_v30, %v2079_v30  ;;  %v456_v34 = vmul.f32 %v2081_v62, %v2081_v62  ;;  %v457_v45 = vmul.f32 %v2083_v3, %v2083_v3  ;;  %v444_v60 = vpop.permute.xlu0 %443 }
 0x16a   :  { %v458_v46 = vmul.f32 %v2091_v39, %v2091_v39  ;;  %v500_v53 = vadd.f32 %v499_v42, %v498_v18  ;;  %v501_v54 = vsel %vm383_vm1, %v2094_v41, 0.0  ;;  %v459_v40 = vmul.f32 %v2102_v47, %v2102_v47 }
 0x16b   :  { %v463_v43 = vsel %vm383_vm1, %v455_v21, 0.0  ;;  %v462_v44 = vsel %vm383_vm1, %v454_v28, 0.0  ;;  %v465_v58 = vsel %vm383_vm1, %v456_v34, 0.0  ;;  %v467_v2 = vsel %vm383_vm1, %v457_v45, 0.0 }
 0x16c   :  { %v464_v50 = vadd.f32 %v463_v43, %v462_v44  ;;  %v2121_v63 = vmul.f32 %v444_v60, %v413_v37  ;;  %v502_v0 = vadd.f32 %v501_v54, %v500_v53  ;;  %v503_v1 = vsel %vm383_vm1, %v2106_v48, 0.0  ;;  %v534_v37 = vpop.permute.xlu1 %533 }
 0x16d   :  { %v469_v10 = vsel %vm383_vm1, %v458_v46, 0.0  ;;  %v460_v55 = vmul.f32 %v2111_v52, %v2111_v52  ;;  %v471_v12 = vsel %vm383_vm1, %v459_v40, 0.0  ;;  %v530_v32 = vpop.permute.xlu0 %529 }
 0x16e   :  { %v466_v59 = vadd.f32 %v465_v58, %v464_v50  ;;  %v504_v6 = vadd.f32 %v503_v1, %v502_v0  ;;  %v461_v14 = vmul.f32 %v2121_v63, %v2121_v63 }
 0x16f   :  { %v473_v16 = vsel %vm383_vm1, %v460_v55, 0.0 }
 0x170   :  { %v468_v5 = vadd.f32 %v467_v2, %v466_v59  ;;  %v506_v15 = vadd.f32 %v505_v7, %v504_v6  ;;  %v475_v19 = vsel %vm383_vm1, %v461_v14, 0.0  ;;  %v542_v58 = vpop.permute.xlu1 %541 }
 0x171   :  { %v538_v34 = vpop.permute.xlu0 %537 }
 0x172   :  { %v470_v8 = vadd.f32 %v469_v10, %v468_v5  ;;  %v508_v17 = vadd.f32 %v507_v20, %v506_v15 }
 0x174   :  { %v472_v49 = vadd.f32 %v471_v12, %v470_v8  ;;  %v509_v22 = vrot.slane %v508_v17, 4  ;;  %v550_v55 = vpop.permute.xlu1 %549 }
 0x176   :  { %v474_v18 = vadd.f32 %v473_v16, %v472_v49  ;;  %v510_v26 = vadd.f32 %v509_v22, %v508_v17 }
 0x178   :  { %v476_v23 = vadd.f32 %v475_v19, %v474_v18  ;;  %v511_v29 = vrot.slane %v510_v26, 2 }
 0x17a   :  { %v477_v27 = vrot.slane %v476_v23, 4  ;;  %v512_v33 = vadd.f32 %v511_v29, %v510_v26 }
 0x17c   :  { %v478_v31 = vadd.f32 %v477_v27, %v476_v23  ;;  %v513_v36 = vrot.slane %v512_v33, 1 }
 0x17e   :  { %v479_v35 = vrot.slane %v478_v31, 2  ;;  %v514_v21 = vadd.f32 %v513_v36, %v512_v33 }
 0x180   :  { %v480_v11 = vadd.f32 %v479_v35, %v478_v31  ;;  %v515_v42 = vmul.f32 0.016393442, %v514_v21 }
 0x182   :  { %v481_v28 = vrot.slane %v480_v11, 1  ;;  %v516_v44 = vsub.f32 %v2055_v56, %v515_v42  ;;  %v517_v45 = vsub.f32 %v2057_v61, %v515_v42  ;;  %v518_v50 = vsub.f32 %v2063_v9, %v515_v42  ;;  %v546_v9 = vpop.permute.xlu0 %545 }
 0x183   :  { %v519_v51 = vsub.f32 %v2067_v25, %v515_v42  ;;  %v520_v53 = vsub.f32 %v2094_v41, %v515_v42  ;;  %v521_v54 = vsub.f32 %v2106_v48, %v515_v42  ;;  %v522_v59 = vsub.f32 %v2116_v57, %v515_v42 }
 0x184   :  { %v482_v43 = vadd.f32 %v481_v28, %v480_v11  ;;  %v2148_v60 = vmul.f32 %v526_v24, %v516_v44  ;;  %v2150_v2 = vmul.f32 %v530_v32, %v517_v45  ;;  %v2152_v40 = vmul.f32 %v534_v37, %v518_v50 }
 0x185   :  { %v2154_v56 = vmul.f32 %v538_v34, %v519_v51  ;;  %v2162_v57 = vmul.f32 %v542_v58, %v520_v53  ;;  %v2168_v10 = vmul.f32 %v546_v9, %v521_v54  ;;  %v2170_v7 = vmul.f32 %v550_v55, %v522_v59  ;;  %v606_v51 = vld [vmem:[#allocation4 + $0x10] sm:$0xff]  ;;  %v608_v53 = vld [vmem:[#allocation4 + $0x20] sm:$0xff] }
 0x186   :  { %v483_v46 = vmul.f32 0.016393442, %v482_v43  ;;  %v564_v25 = vmul.f32 %v2148_v60, %v2148_v60  ;;  %v565_v41 = vmul.f32 %v2150_v2, %v2150_v2  ;;  %v566_v48 = vmul.f32 %v2152_v40, %v2152_v40  ;;  %v554_v20 = vpop.permute.xlu0 %553 }
 0x187   :  { %v567_v5 = vmul.f32 %v2154_v56, %v2154_v56  ;;  %v568_v12 = vmul.f32 %v2162_v57, %v2162_v57  ;;  %v523_v14 = vsub.f32 %v2127_v4, %v515_v42  ;;  %v569_v16 = vmul.f32 %v2168_v10, %v2168_v10 }
 0x188   :  { %v484_v61 = vadd.f32 1e-06, %v483_v46  ;;  %v572_v0 = vsel %vm383_vm1, %v564_v25, 0.0  ;;  %v573_v1 = vsel %vm383_vm1, %v565_v41, 0.0  ;;  %v575_v8 = vsel %vm383_vm1, %v566_v48, 0.0  ;;  %v607_v46 = vld [vmem:[#allocation4 + $0x18] sm:$0xff] }
 0x189   :  { %v574_v6 = vadd.f32 %v573_v1, %v572_v0  ;;  %v577_v49 = vsel %vm383_vm1, %v567_v5, 0.0  ;;  %v563_v17 = vmul.f32 %v554_v20, %v523_v14  ;;  %v570_v19 = vmul.f32 %v2170_v7, %v2170_v7 }
 0x18a   :  { %1680 = vrsqrt.f32 %v484_v61  ;;  %v579_v22 = vsel %vm383_vm1, %v568_v12, 0.0  ;;  %v581_v24 = vsel %vm383_vm1, %v569_v16, 0.0 }
 0x18b   :  { %v576_v15 = vadd.f32 %v575_v8, %v574_v6  ;;  %v571_v26 = vmul.f32 %v563_v17, %v563_v17  ;;  %v583_v29 = vsel %vm383_vm1, %v570_v19, 0.0 }
 0x18d   :  { %v578_v18 = vadd.f32 %v577_v49, %v576_v15  ;;  %v585_v28 = vsel %vm383_vm1, %v571_v26, 0.0 }
 0x18f   :  { %v580_v23 = vadd.f32 %v579_v22, %v578_v18 }
 0x191   :  { %v582_v4 = vadd.f32 %v581_v24, %v580_v23 }
 0x193   :  { %v584_v36 = vadd.f32 %v583_v29, %v582_v4  ;;  %v1817_v4 = vmov 0.0   ;;  %v1014_v29 = vld [vmem:[%s2316_s7] sm:$0xff] }
 0x194   :  { %v1681_v27 = vpop.eup %1680  ;;  %1497 = vmatprep.mubr.msk.f32.mxu0 %vm1816_vm4, %v1817_v4 }
 0x195   :  { %v493_v31 = vmul.f32 %v1681_v27, %v2121_v63  ;;  %v486_v32 = vmul.f32 %v1681_v27, %v2079_v30  ;;  %v487_v33 = vmul.f32 %v1681_v27, %v2077_v38  ;;  %v488_v35 = vmul.f32 %v1681_v27, %v2081_v62 }
 0x196   :  { %v489_v37 = vmul.f32 %v1681_v27, %v2083_v3  ;;  %v490_v11 = vmul.f32 %v1681_v27, %v2091_v39  ;;  %v491_v21 = vmul.f32 %v1681_v27, %v2102_v47  ;;  %v492_v42 = vmul.f32 %v1681_v27, %v2111_v52  ;;  %v605_v52 = vld [vmem:[#allocation4 + $0x8] sm:$0xff] }
 0x197   :  { %v1535_v34 = vpack.c.bf16 %v487_v33, %v486_v32  ;;  %v586_v43 = vadd.f32 %v585_v28, %v584_v36  ;;  %v1815_v27 = vmov 0.0|0.0   ;;  %v1016_v32 = vld [vmem:[%s2316_s7 + $0x10] sm:$0xff]  ;;  %v1818_v33 = vmov 2   ;;  %v1017_v36 = vld [vmem:[%s2316_s7 + $0x18] sm:$0xff] }
 0x198   :  { %v1539_v63 = vpack.c.bf16 %v489_v37, %v488_v35  ;;  %v1543_v44 = vpack.c.bf16 %v491_v21, %v490_v11  ;;  %v1547_v30 = vpack.c.bf16 %v493_v31, %v492_v42  ;;  %1573 = vmatprep.subr.bf16.mxu0 %v1815_v27  ;;  %v1015_v31 = vld [vmem:[%s2316_s7 + $0x8] sm:$0xff]  ;;  %1678 = vset.pattern.permute.xlu1 %v1818_v33  ;;  %v1018_v11 = vld [vmem:[%s2316_s7 + $0x20] sm:$0xff] }
 0x199   :  { %1536 = vmatprep.subr.bf16.mxu1 %v1535_v34  ;;  %v587_v38 = vrot.slane %v586_v43, 4  ;;  %v1574_v35 = vpack.c.bf16 %v1015_v31, %v1014_v29  ;;  %v1577_v37 = vpack.c.bf16 %v1017_v36, %v1016_v32  ;;  %v1019_v21 = vld [vmem:[%s2316_s7 + $0x28] sm:$0xff]  ;;  %v1134_v29 = vld [vmem:[#allocation9 + $0xa8] sm:$0xff] }
 0x19a   :  { %1538 = vmatpush3.bf16.msra.mxu1 %v1535_v34  ;;  %v1580_v28 = vpack.c.bf16 %v1019_v21, %v1018_v11  ;;  %v1021_v34 = vld [vmem:[%s2316_s7 + $0x38] sm:$0xff]  ;;  %v1141_v32 = vld [vmem:[#allocation9 + $0xe0] sm:$0xff]  ;;  %v1144_v11 = vld [vmem:[#allocation9 + $0xf8] sm:$0xff] }
 0x19b   :  { %1540 = vmatprep.subr.bf16.mxu1 %v1539_v63  ;;  %v588_v62 = vadd.f32 %v587_v38, %v586_v43  ;;  %1575 = vmatpush3.bf16.msra.mxu0 %v1574_v35  ;;  %v1022_v43 = vld [vmem:[%s2316_s7 + $0x40] sm:$0xff]  ;;  %v1025_v38 = vld [vmem:[%s2316_s7 + $0x58] sm:$0xff]  ;;  %v1137_v36 = vld [vmem:[#allocation9 + $0xc0] sm:$0xff] }
 0x19c   :  { %1576 = vmatprep.subr.bf16.mxu0 %v1815_v27  ;;  %v1138_v31 = vld [vmem:[#allocation9 + $0xc8] sm:$0xff]  ;;  %v1147_v21 = vld [vmem:[#allocation9 + $0x110] sm:$0xff] }
 0x19d   :  { %v589_v45 = vrot.slane %v588_v62, 2  ;;  %v1613_v35 = vpack.c.bf16 %v1141_v32, %v1138_v31 }
 0x19e   :  { %1542 = vmatpush3.bf16.msra.mxu1 %v1539_v63  ;;  %v1023_v63 = vld [vmem:[%s2316_s7 + $0x48] sm:$0xff] }
 0x19f   :  { %1544 = vmatprep.subr.bf16.mxu1 %v1543_v44  ;;  %v590_v3 = vadd.f32 %v589_v45, %v588_v62  ;;  %1578 = vmatpush3.bf16.msra.mxu0 %v1577_v37  ;;  %v1026_v45 = vld [vmem:[%s2316_s7 + $0x60] sm:$0xff] }
 0x1a0   :  { %1579 = vmatprep.subr.bf16.mxu0 %v1815_v27  ;;  %v1140_v37 = vld [vmem:[#allocation9 + $0xd8] sm:$0xff] }
 0x1a1   :  { %v591_v39 = vrot.slane %v590_v3, 1 }
 0x1a2   :  { %1546 = vmatpush3.bf16.msra.mxu1 %v1543_v44  ;;  %v1586_v44 = vpack.c.bf16 %v1023_v63, %v1022_v43  ;;  %v1150_v43 = vld [vmem:[#allocation9 + $0x128] sm:$0xff]  ;;  %v1153_v63 = vld [vmem:[#allocation9 + $0x140] sm:$0xff] }
 0x1a3   :  { %1548 = vmatprep.subr.bf16.mxu1 %v1547_v30  ;;  %v592_v47 = vadd.f32 %v591_v39, %v590_v3  ;;  %1581 = vmatpush3.bf16.msra.mxu0 %v1580_v28  ;;  %v1027_v3 = vld [vmem:[%s2316_s7 + $0x68] sm:$0xff]  ;;  %v1615_v28 = vpack.c.bf16 %v1140_v37, %v1137_v36 }
 0x1a4   :  { %1582 = vmatprep.subr.bf16.mxu0 %v1815_v27  ;;  %v1592_v39 = vpack.c.bf16 %v1027_v3, %v1026_v45  ;;  %v1156_v45 = vld [vmem:[#allocation9 + $0x158] sm:$0xff]  ;;  %v1159_v3 = vld [vmem:[#allocation9 + $0x170] sm:$0xff] }
 0x1a5   :  { %v593_v50 = vmul.f32 0.016393442, %v592_v47  ;;  %v1028_v47 = vld [vmem:[%s2316_s7 + $0x70] sm:$0xff] }
 0x1a6   :  { %1550 = vmatpush3.bf16.msra.mxu1 %v1547_v30  ;;  %v1024_v30 = vld [vmem:[%s2316_s7 + $0x50] sm:$0xff] }
 0x1a7   :  { %v594_v58 = vadd.f32 1e-06, %v593_v50  ;;  %v1589_v62 = vpack.c.bf16 %v1025_v38, %v1024_v30  ;;  %v1029_v50 = vld [vmem:[%s2316_s7 + $0x78] sm:$0xff]  ;;  %v1621_v30 = vpack.c.bf16 %v1153_v63, %v1150_v43  ;;  %v1149_v38 = vld [vmem:[#allocation9 + $0x120] sm:$0xff] }
 0x1a9   :  { %1419 = vmatmul.mubr.msk.f32.vlgmr.msra.gmra.mrb[8].mxu1 %vm612_vm0, %v605_v52  ;;  %1682 = vrsqrt.f32 %v594_v58  ;;  %v1595_v52 = vpack.c.bf16 %v1029_v50, %v1028_v47  ;;  %v828_v58 = vld [vmem:[%s2314_s5] sm:$0xff]  ;;  %v1625_v47 = vpack.c.bf16 %v1159_v3, %v1156_v45 }
 0x1aa   :  { %1421 = vmatprep.mubr.msk.f32.mxu1 %vm612_vm0, %v606_v51  ;;  %v829_v51 = vld [vmem:[%s2314_s5 + $0x8] sm:$0xff]  ;;  %v1155_v50 = vld [vmem:[#allocation9 + $0x150] sm:$0xff] }
 0x1ad   :  { %1422 = vmatmul.mubr.msk.f32.gmra.mrb[10].mxu1 %vm612_vm0, %v607_v46 }
 0x1ae   :  { %1440 = vmatprep.mubr.msk.f32.mxu1 %vm612_vm0, %v608_v53 }
 0x1b3   :  { %v1683_v54 = vpop.eup %1682 }
 0x1b4   :  { %v603_v59 = vmul.f32 %v1683_v54, %v563_v17  ;;  %v596_v61 = vmul.f32 %v1683_v54, %v2148_v60  ;;  %v597_v9 = vmul.f32 %v1683_v54, %v2150_v2  ;;  %v598_v25 = vmul.f32 %v1683_v54, %v2152_v40  ;;  %v609_v60 = vld [vmem:[#allocation4 + $0x28] sm:$0xff]  ;;  %v610_v2 = vld [vmem:[#allocation4 + $0x30] sm:$0xff]  ;;  %v611_v40 = vld [vmem:[#allocation4 + $0x38] sm:$0xff] }
 0x1b5   :  { %v599_v41 = vmul.f32 %v1683_v54, %v2154_v56  ;;  %v600_v48 = vmul.f32 %v1683_v54, %v2162_v57  ;;  %v601_v0 = vmul.f32 %v1683_v54, %v2168_v10  ;;  %v602_v1 = vmul.f32 %v1683_v54, %v2170_v7  ;;  %v827_v56 = vld [vmem:[#allocation6] sm:$0xf] }
 0x1b6   :  { %v1551_v5 = vpack.c.bf16 %v597_v9, %v596_v61  ;;  %v831_v61 = vld [vmem:[%s2314_s5 + $0x18] sm:$0xff]  ;;  %v830_v9 = vld [vmem:[%s2314_s5 + $0x10] sm:$0xff] }
 0x1b7   :  { %v1555_v55 = vpack.c.bf16 %v599_v41, %v598_v25  ;;  %v1559_v6 = vpack.c.bf16 %v601_v0, %v600_v48  ;;  %v1563_v8 = vpack.c.bf16 %v603_v59, %v602_v1  ;;  %v1114_v48 = vld [vmem:[#allocation9 + $0x8] sm:$0xff]  ;;  %v1117_v0 = vld [vmem:[#allocation9 + $0x20] sm:$0xff] }
 0x1b8   :  { %1552 = vmatprep.subr.bf16.mxu1 %v1551_v5 }
 0x1b9   :  { %1554 = vmatpush3.bf16.msra.mxu1 %v1551_v5 }
 0x1ba   :  { %1556 = vmatprep.subr.bf16.mxu1 %v1555_v55 }
 0x1bd   :  { %1558 = vmatpush3.bf16.msra.mxu1 %v1555_v55 }
 0x1be   :  { %1560 = vmatprep.subr.bf16.mxu1 %v1559_v6 }
 0x1c1   :  { %1562 = vmatpush3.bf16.msra.mxu1 %v1559_v6  ;;  %v1597_v6 = vpack.c.bf16 %v1117_v0, %v1114_v48  ;;  %v1121_v0 = vld [vmem:[#allocation9 + $0x40] sm:$0xff] }
 0x1c2   :  { %1564 = vmatprep.subr.bf16.mxu1 %v1563_v8 }
 0x1c5   :  { %1566 = vmatpush3.bf16.msra.mxu1 %v1563_v8  ;;  %v1113_v8 = vld [vmem:[#allocation9] sm:$0xff] }
 0x1c6   :  { %1446 = vmatprep.subr.msk.mxu1 %vm845_vm2, %v827_v56 }
 0x1c8   :  { %1441 = vmatmul.mubr.msk.f32.vlgmr.msra.gmra.mrb[12].mxu1 %vm612_vm0, %v609_v60  ;;  %v1116_v60 = vld [vmem:[#allocation9 + $0x18] sm:$0xff] }
 0x1c9   :  { %1443 = vmatprep.mubr.msk.f32.mxu1 %vm612_vm0, %v610_v2  ;;  %1447 = vmatpush3.msk.msra.mxu1 %vm845_vm2, %v827_v56  ;;  %v1123_v56 = vld [vmem:[#allocation9 + $0x50] sm:$0xff] }
 0x1ca   :  { %1567 = vmatprep.subr.bf16.mxu1 %v1815_v27 }
 0x1cc   :  { %1444 = vmatmul.mubr.msk.f32.gmra.mrb[14].mxu1 %vm612_vm0, %v611_v40  ;;  %v1120_v40 = vld [vmem:[#allocation9 + $0x38] sm:$0xff] }
 0x27c   :  { %v1420_v57 = vpop.f32.mrb[8].mxu1 }
 0x27d   :  { %v691_v10 = vpop.f32.mrb[9].mxu1 }
 0x280   :  { %v1423_v7 = vpop.f32.mrb[10].mxu1 }
 0x281   :  { %v701_v12 = vpop.f32.mrb[11].mxu1 }
 0x29b   :  { %v1442_v14 = vpop.f32.mrb[12].mxu1 }
 0x29c   :  { %813 = vrot.lane.b32.xlu0 %v1442_v14, %s1814_s19  ;;  %v788_v15 = vpop.f32.mrb[13].mxu1  ;;  %v1122_v14 = vld [vmem:[#allocation9 + $0x48] sm:$0xff] }
 0x29d   :  { %811 = vrot.lane.b32.xlu1 %v788_v15, %s1814_s19  ;;  %v1126_v15 = vld [vmem:[#allocation9 + $0x68] sm:$0xff] }
 0x29f   :  { %v1445_v20 = vpop.f32.mrb[14].mxu1 }
 0x2a0   :  { %817 = vrot.lane.b32.xlu0 %v1445_v20, %s1814_s19  ;;  %v798_v49 = vpop.f32.mrb[15].mxu1  ;;  %v1129_v20 = vld [vmem:[#allocation9 + $0x80] sm:$0xff] }
 0x2a1   :  { %815 = vrot.lane.b32.xlu1 %v798_v49, %s1814_s19 }
 0x2a5   :  { %1010 = vperm.xlu1 %1678, %v1941_v13   ;;  %v1020_v13 = vld [vmem:[%s2316_s7 + $0x30] sm:$0xff] }
 0x2a6   :  { %v1583_v42 = vpack.c.bf16 %v1021_v34, %v1020_v13  ;;  %v1617_v13 = vpack.c.bf16 %v1147_v21, %v1144_v11  ;;  %v1143_v34 = vld [vmem:[#allocation9 + $0xf0] sm:$0xff] }
 0x2a8   :  { %1584 = vmatpush3.bf16.msra.mxu0 %v1583_v42  ;;  %v1146_v42 = vld [vmem:[#allocation9 + $0x108] sm:$0xff] }
 0x2a9   :  { %1585 = vmatprep.subr.bf16.mxu0 %v1815_v27 }
 0x2ac   :  { %1587 = vmatpush3.bf16.msra.mxu0 %v1586_v44  ;;  %v1619_v44 = vpack.c.bf16 %v1146_v42, %v1143_v34 }
 0x2ad   :  { %1588 = vmatprep.subr.bf16.mxu0 %v1815_v27 }
 0x2b0   :  { %1590 = vmatpush3.bf16.msra.mxu0 %v1589_v62  ;;  %v1152_v62 = vld [vmem:[#allocation9 + $0x138] sm:$0xff] }
 0x2b1   :  { %1591 = vmatprep.subr.bf16.mxu0 %v1815_v27 }
 0x2b4   :  { %1593 = vmatpush3.bf16.msra.mxu0 %v1592_v39  ;;  %v1623_v39 = vpack.c.bf16 %v1152_v62, %v1149_v38 }
 0x2b5   :  { %1594 = vmatprep.subr.bf16.mxu0 %v1815_v27 }
 0x2b8   :  { %1596 = vmatpush3.bf16.msra.mxu0 %v1595_v52  ;;  %v1158_v52 = vld [vmem:[#allocation9 + $0x168] sm:$0xff] }
 0x2b9   :  { %1629 = vmatprep.subr.bf16.mxu0 %v1815_v27 }
 0x30e   :  { %v814_v16 = vpop.permute.xlu0 %813 }
 0x30f   :  { %v812_v17 = vpop.permute.xlu1 %811  ;;  %v824_v19 = vsel %vm383_vm1, %v1420_v57, %v814_v16  ;;  %v934_v57 = vld [vmem:[#allocation7] sm:$0x3f]  ;;  %v1605_v16 = vpack.c.bf16 %v1129_v20, %v1126_v15  ;;  %v1154_v15 = vld [vmem:[#allocation9 + $0x148] sm:$0xff] }
 0x310   :  { %v823_v18 = vsel %vm383_vm1, %v691_v10, %v812_v17  ;;  %v1599_v10 = vpack.c.bf16 %v1116_v60, %v1113_v8  ;;  %v1125_v17 = vld [vmem:[#allocation9 + $0x60] sm:$0xff] }
 0x311   :  { %1448 = vmatprep.mubr.msk.f32.mxu1 %vm832_vm3, %v823_v18  ;;  %v1128_v18 = vld [vmem:[#allocation9 + $0x78] sm:$0xff]  ;;  %v1133_v60 = vld [vmem:[#allocation9 + $0xa0] sm:$0xff] }
 0x312   :  { %1449 = vmatmul.mubr.msk.f32.vlgmr.msra.gmra.mrb[16].mxu1 %vm832_vm3, %v824_v19  ;;  %v818_v22 = vpop.permute.xlu0 %817  ;;  %v1132_v19 = vld [vmem:[#allocation9 + $0x98] sm:$0xff] }
 0x313   :  { %v816_v23 = vpop.permute.xlu1 %815  ;;  %v826_v26 = vsel %vm383_vm1, %v1423_v7, %v818_v22  ;;  %v1601_v7 = vpack.c.bf16 %v1123_v56, %v1120_v40  ;;  %v1135_v22 = vld [vmem:[#allocation9 + $0xb0] sm:$0xff] }
 0x314   :  { %v825_v24 = vsel %vm383_vm1, %v701_v12, %v816_v23  ;;  %v1119_v12 = vld [vmem:[#allocation9 + $0x30] sm:$0xff]  ;;  %v1607_v23 = vpack.c.bf16 %v1128_v18, %v1125_v17 }
 0x315   :  { %1451 = vmatprep.mubr.msk.f32.mxu1 %vm832_vm3, %v825_v24  ;;  %v1603_v49 = vpack.c.bf16 %v1122_v14, %v1119_v12  ;;  %v1609_v24 = vpack.c.bf16 %v1135_v22, %v1132_v19  ;;  %v1139_v56 = vld [vmem:[#allocation9 + $0xd0] sm:$0xff] }
 0x316   :  { %1452 = vmatmul.mubr.msk.f32.gmra.mrb[18].mxu1 %vm832_vm3, %v826_v26  ;;  %v1131_v26 = vld [vmem:[#allocation9 + $0x90] sm:$0xff] }
 0x317   :  { %1462 = vmatprep.mubr.msk.f32.mxu1 %vm1816_vm4, %v1817_v4  ;;  %v1611_v33 = vpack.c.bf16 %v1134_v29, %v1131_v26  ;;  %v1151_v14 = vld [vmem:[#allocation9 + $0x130] sm:$0xff] }
 0x318   :  { %v1648_v20 = vpack.c.bf16 %v1154_v15, %v1151_v14 }
 0x3e5   :  { %v1450_v46 = vpop.f32.mrb[16].mxu1 }
 0x3e6   :  { %v921_v53 = vadd.f32 %v1450_v46, %v829_v51  ;;  %v915_v54 = vpop.f32.mrb[17].mxu1  ;;  %v1627_v51 = vpack.c.bf16 %v1158_v52, %v1155_v50  ;;  %v1684_v46 = vld [vmem:[%s2311_s2] sm:$0xff] }
 0x3e7   :  { %v916_v59 = vadd.f32 %v915_v54, %v828_v58  ;;  %v1819_v58 = vmov 3   ;;  %v1118_v54 = vld [vmem:[#allocation9 + $0x28] sm:$0xff] }
 0x3e8   :  { %1679 = vset.pattern.permute.xlu0 %v1819_v58 }
 0x3e9   :  { %v1568_v25 = vpack.c.bf16 %v921_v53, %v916_v59  ;;  %v1453_v41 = vpop.f32.mrb[18].mxu1  ;;  %1031 = vperm.xlu0 %1679, %v1684_v46   ;;  %v1115_v53 = vld [vmem:[#allocation9 + $0x10] sm:$0xff]  ;;  %v1011_v59 = vpop.permute.xlu1 %1010 }
 0x3ea   :  { %v931_v1 = vadd.f32 %v1453_v41, %v831_v61  ;;  %v925_v5 = vpop.f32.mrb[19].mxu1 }
 0x3eb   :  { %v926_v55 = vadd.f32 %v925_v5, %v830_v9  ;;  %1569 = vmatpush3.bf16.msra.mxu1 %v1568_v25  ;;  %v1630_v9 = vpack.c.bf16 %v1118_v54, %v1115_v53 }
 0x3ec   :  { %1570 = vmatprep.subr.bf16.mxu1 %v1815_v27 }
 0x3ed   :  { %v1571_v2 = vpack.c.bf16 %v931_v1, %v926_v55  ;;  %v1124_v1 = vld [vmem:[#allocation9 + $0x58] sm:$0xff]  ;;  %v1127_v55 = vld [vmem:[#allocation9 + $0x70] sm:$0xff] }
 0x3ee   :  { %v1633_v5 = vpack.c.bf16 %v1124_v1, %v1121_v0 }
 0x3ef   :  { %1572 = vmatpush3.bf16.msra.mxu1 %v1571_v2  ;;  %v1136_v2 = vld [vmem:[#allocation9 + $0xb8] sm:$0xff] }
 0x3f0   :  { %1598 = vmatprep.subr.bf16.mxu1 %v1597_v6  ;;  %v1130_v6 = vld [vmem:[#allocation9 + $0x88] sm:$0xff]  ;;  %v1639_v40 = vpack.c.bf16 %v1136_v2, %v1133_v60 }
 0x3f1   :  { %v1636_v8 = vpack.c.bf16 %v1130_v6, %v1127_v55 }
 0x3f2   :  { %1463 = vmatmul.mubr.msk.f32.vlgmr.msra.gmra.mrb[20].mxu1 %vm935_vm5, %v934_v57  ;;  %v1142_v57 = vld [vmem:[#allocation9 + $0xe8] sm:$0xff] }
 0x3f3   :  { %1600 = vmatpush1.bf16.msra.mxu1 %v1599_v10  ;;  %1225 = vmatprep.mubr.f32.mxu1 %v1817_v4  ;;  %v1642_v10 = vpack.c.bf16 %v1142_v57, %v1139_v56 }
 0x3f4   :  { %1602 = vmatprep.subr.bf16.mxu1 %v1601_v7  ;;  %v1148_v7 = vld [vmem:[#allocation9 + $0x118] sm:$0xff] }
 0x3f7   :  { %1604 = vmatpush1.bf16.msra.mxu1 %v1603_v49  ;;  %v1157_v49 = vld [vmem:[#allocation9 + $0x160] sm:$0xff] }
 0x3f8   :  { %1606 = vmatprep.subr.bf16.mxu1 %v1605_v16  ;;  %v1160_v16 = vld [vmem:[#allocation9 + $0x178] sm:$0xff] }
 0x3f9   :  { %v1651_v17 = vpack.c.bf16 %v1160_v16, %v1157_v49 }
 0x3fb   :  { %1608 = vmatpush1.bf16.msra.mxu1 %v1607_v23 }
 0x3fc   :  { %1610 = vmatprep.subr.bf16.mxu1 %v1609_v24 }
 0x3ff   :  { %1612 = vmatpush1.bf16.msra.mxu1 %v1611_v33 }
 0x400   :  { %1614 = vmatprep.subr.bf16.mxu1 %v1613_v35 }
 0x403   :  { %1616 = vmatpush1.bf16.msra.mxu1 %v1615_v28 }
 0x404   :  { %1618 = vmatprep.subr.bf16.mxu1 %v1617_v13 }
 0x407   :  { %1620 = vmatpush1.bf16.msra.mxu1 %v1619_v44 }
 0x408   :  { %1622 = vmatprep.subr.bf16.mxu1 %v1621_v30 }
 0x40b   :  { %1624 = vmatpush1.bf16.msra.mxu1 %v1623_v39 }
 0x40c   :  { %1626 = vmatprep.subr.bf16.mxu1 %v1625_v47 }
 0x40f   :  { %1628 = vmatpush1.bf16.msra.mxu1 %v1627_v51 }
 0x468   :  { %v1032_v18 = vpop.permute.xlu0 %1031 }
 0x4c5   :  { %v1005_v61 = vpop.f32.mrb[20].mxu1 }
 0x4c6   :  { %v1013_v25 = vadd.f32 %v1011_v59, %v1005_v61  ;;  %v1035_v41 = vrot.slane %v1005_v61, 3  ;;  %v1464_v48 = vpop.f32.mrb[21].mxu1 }
 0x4c8   :  { %1498 = vmatmul.mubr.f32.vlgmr.msra.gmra.mrb[24].mxu0 %v1035_v41  ;;  %1226 = vmatmul.mubr.f32.vlgmr.msra.gmra.mrb[22].mxu1 %v1013_v25 }
 0x4c9   :  { %1631 = vmatpush3.bf16.msra.mxu0 %v1630_v9  ;;  %1532 = vmatprep.mubr.msk.f32.mxu0 %vm1816_vm4, %v1817_v4  ;;  %v1145_v4 = vld [vmem:[#allocation9 + $0x100] sm:$0xff] }
 0x4ca   :  { %1632 = vmatprep.subr.bf16.mxu0 %v1815_v27  ;;  %v1645_v12 = vpack.c.bf16 %v1148_v7, %v1145_v4 }
 0x4cd   :  { %1634 = vmatpush3.bf16.msra.mxu0 %v1633_v5 }
 0x4ce   :  { %1635 = vmatprep.subr.bf16.mxu0 %v1815_v27 }
 0x4d1   :  { %1637 = vmatpush3.bf16.msra.mxu0 %v1636_v8 }
 0x4d2   :  { %1638 = vmatprep.subr.bf16.mxu0 %v1815_v27 }
 0x4d5   :  { %1640 = vmatpush3.bf16.msra.mxu0 %v1639_v40 }
 0x4d6   :  { %1641 = vmatprep.subr.bf16.mxu0 %v1815_v27 }
 0x4d9   :  { %1643 = vmatpush3.bf16.msra.mxu0 %v1642_v10 }
 0x4da   :  { %1644 = vmatprep.subr.bf16.mxu0 %v1815_v27 }
 0x4dd   :  { %1646 = vmatpush3.bf16.msra.mxu0 %v1645_v12 }
 0x4de   :  { %1647 = vmatprep.subr.bf16.mxu0 %v1815_v27 }
 0x4e1   :  { %1649 = vmatpush3.bf16.msra.mxu0 %v1648_v20 }
 0x4e2   :  { %1650 = vmatprep.subr.bf16.mxu0 %v1815_v27 }
 0x4e5   :  { %1652 = vmatpush3.bf16.msra.mxu0 %v1651_v17 }
 0x4e8   :  { %1533 = vmatmul.mubr.f32.vlgmr.msra.gmra.mrb[26].mxu0 %v1013_v25 }
 0x59b   :  { %v1103_v19 = vpop.f32.mrb[24].mxu0  ;;  %v1227_v22 = vpop.f32.mrb[22].mxu1 }
 0x59c   :  { %v1104_v23 = vadd.f32 %v1103_v19, %v1032_v18  ;;  %v1499_v24 = vpop.f32.mrb[25].mxu0  ;;  %v1229_v26 = vpop.f32.mrb[23].mxu1 }
 0x59d   :  { %v1304_v29 = vcombine.low %v1227_v22, %v1229_v26 }
 0x59e   :  { %v1108_v31 = vrot.slane %v1104_v23, 5 }
 0x59f   :  { %1306 = vst [vmem:[%s2319_s10] sm:$0x77] %v1304_v29 }
 0x5a0   :  { %v1111_v32 = vsel %vm1110_vm6, %v1013_v25, %v1108_v31 }
 0x5a1   :  { %1112 = vst [vmem:[%s2318_s9] sm:$0x3f] %v1111_v32 }
 0x5bb   :  { %v1298_v27 = vpop.f32.mrb[26].mxu0 }
 0x5bc   :  { %1307 = vst [vmem:[%s2319_s10 + $0x8] sm:$0x7] %v1298_v27  ;;  %v1534_v33 = vpop.f32.mrb[27].mxu0 }
 0x5bd   :  { %1316 = vsyncpa [#allocation3], 1 }
 0x5be   :  { %1317 = vsyncpa [#allocation5], 1 }
 0x5bf   :  { %1318 = vsyncpa [#allocation8], 1 }

</bundles_post_ra>
